<compile_context>
chip_gen: v6e
topology: v6e:2x2x1
jax: 0.10.0
libtpu: 0.0.40
codegen_flags: <defaults>
</compile_context>

<pallas_src>
import functools

import jax
import jax.numpy as jnp
from jax import lax
from jax.experimental import pallas as pl
from jax.experimental.pallas import tpu as pltpu


def refocus_attention_kernel(xq_ref, xf_ref, td_ref,
                             wq_ref, wk_ref, wv_ref, wproj_ref, bproj_ref,
                             out_ref,
                             k_sc, v_sc, o_sc,
                             *, num_heads, scale):
    """One grid step = (batch element b, query tile qi)."""
    qi = pl.program_id(1)

    # --- K/V projection: once per batch element, reused across query tiles. ---
    @pl.when(qi == 0)
    def _project_kv():
        xf = xf_ref[...]                                    # (N, C) input dtype
        k_sc[...] = jnp.dot(
            xf.astype(jnp.bfloat16), wk_ref[...],
            preferred_element_type=jnp.float32).astype(jnp.bfloat16)
        # Exact fold of the td branch: qkv has no bias, so
        # v = x @ W_v + td @ W_v == (x + td) @ W_v.
        xv = (xf + td_ref[...]).astype(jnp.bfloat16)
        v_sc[...] = jnp.dot(
            xv, wv_ref[...],
            preferred_element_type=jnp.float32).astype(jnp.bfloat16)

    # --- Q projection for this query tile (scale folded into q). ---
    xq = xq_ref[...].astype(jnp.bfloat16)                    # (block_q, C)
    q_all = jnp.dot(xq, wq_ref[...],
                    preferred_element_type=jnp.float32) * scale
    q_all = q_all.astype(jnp.bfloat16)                       # (block_q, C)

    C = q_all.shape[-1]
    hd = C // num_heads

    # --- Per-head attention, accumulated into VMEM scratch (no concat). ---
    for h in range(num_heads):                               # static unroll
        lo = h * hd
        qh = q_all[:, lo:lo + hd]                            # (block_q, hd) bf16
        kh = k_sc[:, lo:lo + hd]                             # (N, hd)       bf16
        vh = v_sc[:, lo:lo + hd]                             # (N, hd)       bf16

        # q @ k^T without an explicit transpose (contract the hd axes).
        s = lax.dot_general(qh, kh, (((1,), (1,)), ((), ())),
                            preferred_element_type=jnp.float32)   # (block_q, N)
        s = s - jnp.max(s, axis=-1, keepdims=True)           # stable softmax (f32)
        e = jnp.exp(s)
        p = e * pl.reciprocal(jnp.sum(e, axis=-1, keepdims=True), approx=True)

        o_sc[:, lo:lo + hd] = jnp.dot(
            p.astype(jnp.bfloat16), vh,
            preferred_element_type=jnp.float32)               # (block_q, hd)

    # --- Output projection. ---
    out = jnp.dot(o_sc[...].astype(jnp.bfloat16), wproj_ref[...],
                  preferred_element_type=jnp.float32)
    out = out + bproj_ref[...]                                # (1, C) broadcast
    out_ref[...] = out.astype(out_ref.dtype)


def refocus_attention(x, td, w_qkv, w_proj, b_proj, *, num_heads, block_q=None):
    """x, td: (B, N, C); w_qkv: (C, 3C); w_proj: (C, C); b_proj: (1, C)."""
    B, N, C = x.shape
    assert C % num_heads == 0
    hd = C // num_heads
    scale = hd ** -0.5

    # td=None in the module skips the v-add; with no qkv bias that is
    # equivalent to td == zeros under the (x + td) @ W_v fold.
    if td is None:
        td = jnp.zeros_like(x)

    # Query tiling. Pick a divisor of N so no masked boundary blocks are needed.
    if block_q is None:
        block_q = min(N, 256)
    if N % block_q != 0:
        block_q = N
    num_q = N // block_q

    # Split the fused QKV weight and cast all weights to bf16 once (halves
    # resident weight VMEM and DMA; f32 accumulation keeps accuracy).
    w_q = w_qkv[:, 0 * C:1 * C].astype(jnp.bfloat16)
    w_k = w_qkv[:, 1 * C:2 * C].astype(jnp.bfloat16)
    w_v = w_qkv[:, 2 * C:3 * C].astype(jnp.bfloat16)
    w_p = w_proj.astype(jnp.bfloat16)
    b_p = b_proj.astype(jnp.float32)

    # Rough VMEM budget (weights resident, activation tiles double-buffered,
    # scratch, attention intermediates) with 2x headroom; capped well under
    # v7x's 64 MiB physical VMEM.  NOTE: resident weights could additionally be
    # single-buffered via pipeline_mode=pl.Buffered(1) if VMEM gets tight.
    est = (4 * C * C * 2 + C * 4
           + 2 * block_q * C * 4                 # x q-tile (double-buffered)
           + 2 * 2 * N * C * 4                   # x full + td (double-buffered)
           + 2 * block_q * C * 4                 # out tile
           + 2 * N * C * 2                       # k/v bf16 scratch
           + block_q * C * 4                     # head-output scratch
           + 4 * block_q * N * 4)                # attention intermediates
    vmem_limit = int(min(48 * 1024 * 1024, max(2 * est, 16 * 1024 * 1024)))

    kernel = functools.partial(
        refocus_attention_kernel, num_heads=num_heads, scale=scale)

    return pl.pallas_call(
        kernel,
        out_shape=jax.ShapeDtypeStruct((B, N, C), x.dtype),
        grid_spec=pltpu.PrefetchScalarGridSpec(
            num_scalar_prefetch=0,
            grid=(B, num_q),
            in_specs=[
                # x, query tile for this (b, qi); leading batch dim squeezed.
                pl.BlockSpec((None, block_q, C), lambda b, qi: (b, qi, 0)),
                # x, full sequence for K (constant across qi -> fetched once).
                pl.BlockSpec((None, N, C), lambda b, qi: (b, 0, 0)),
                # td, full sequence for V.
                pl.BlockSpec((None, N, C), lambda b, qi: (b, 0, 0)),
                # Resident bf16 weights + f32 bias.
                pl.BlockSpec((C, C), lambda b, qi: (0, 0)),      # W_q
                pl.BlockSpec((C, C), lambda b, qi: (0, 0)),      # W_k
                pl.BlockSpec((C, C), lambda b, qi: (0, 0)),      # W_v
                pl.BlockSpec((C, C), lambda b, qi: (0, 0)),      # W_proj
                pl.BlockSpec((1, C), lambda b, qi: (0, 0)),      # b_proj
            ],
            out_specs=pl.BlockSpec((None, block_q, C), lambda b, qi: (b, qi, 0)),
            scratch_shapes=[
                pltpu.VMEM((N, C), jnp.bfloat16),        # K (per batch element)
                pltpu.VMEM((N, C), jnp.bfloat16),        # V (per batch element)
                pltpu.VMEM((block_q, C), jnp.float32),   # head-output accumulator
            ],
        ),
        compiler_params=pltpu.CompilerParams(
            # qi carries the K/V scratch -> "arbitrary"; batch is parallel
            # (megacore split across b).
            dimension_semantics=("parallel", "arbitrary"),
            vmem_limit_bytes=vmem_limit),
    )(x, x, td, w_q, w_k, w_v, w_p, b_p)


def refocus_attention_reference(x, td, w_qkv, w_proj, b_proj, *, num_heads):
    """Pure-JAX f32 reference mirroring the PyTorch forward."""
    B, N, C = x.shape
    hd = C // num_heads
    scale = hd ** -0.5
    qkv = (x @ w_qkv).reshape(B, N, 3, num_heads, hd).transpose(2, 0, 3, 1, 4)
    qkv_td = (td @ w_qkv).reshape(B, N, 3, num_heads, hd).transpose(2, 0, 3, 1, 4)
    q, k, v = qkv[0], qkv[1], qkv[2] + qkv_td[2]
    attn = jnp.einsum('bhqd,bhkd->bhqk', q, k) * scale
    attn = jax.nn.softmax(attn, axis=-1)
    o = jnp.einsum('bhqk,bhkd->bhqd', attn, v).transpose(0, 2, 1, 3).reshape(B, N, C)
    return o @ w_proj + b_proj


if __name__ == "__main__":
    # Small, forward-consistent shapes: C=32, num_heads=8 -> head_dim=4.
    # N=16 with block_q=8 exercises the query-tiling path (2 q tiles / batch).
    B, N, C, H = 2, 16, 32, 8

    key = jax.random.PRNGKey(0)
    k_x, k_td, k_wqkv, k_wproj, k_bproj = jax.random.split(key, 5)

    x = jax.random.normal(k_x, (B, N, C), dtype=jnp.float32)
    td = jax.random.normal(k_td, (B, N, C), dtype=jnp.float32)

    # Deterministic synthetic parameters (module default: qkv_bias=False,
    # proj has bias), stored as (in, out) for the kernel.
    w_qkv = jax.random.normal(k_wqkv, (C, 3 * C), dtype=jnp.float32) * (C ** -0.5)
    w_proj = jax.random.normal(k_wproj, (C, C), dtype=jnp.float32) * (C ** -0.5)
    b_proj = jax.random.normal(k_bproj, (1, C), dtype=jnp.float32) * 0.02

    out = refocus_attention(x, td, w_qkv, w_proj, b_proj, num_heads=H, block_q=8)
    out = jax.block_until_ready(out)

    ref = refocus_attention_reference(x, td, w_qkv, w_proj, b_proj, num_heads=H)
    assert out.shape == (B, N, C)
    # Tolerance accounts for bf16 MXU operands (f32 accumulation) in the kernel
    # vs. the full-f32 reference.
    assert jnp.allclose(out, ref, atol=5e-2, rtol=5e-2), "mismatch vs reference"

    print("KERNEL_OK")
</pallas_src>

<mosaic_0001>
module attributes {stable_mosaic.version = 11 : i64} {
  func.func @refocus_attention_kernel(%arg0: i32, %arg1: i32, %arg2: memref<1x8x32xf32, #tpu.memory_space<vmem>>, %arg3: memref<1x16x32xf32, #tpu.memory_space<vmem>>, %arg4: memref<1x16x32xf32, #tpu.memory_space<vmem>>, %arg5: memref<32x32xbf16, #tpu.memory_space<vmem>>, %arg6: memref<32x32xbf16, #tpu.memory_space<vmem>>, %arg7: memref<32x32xbf16, #tpu.memory_space<vmem>>, %arg8: memref<32x32xbf16, #tpu.memory_space<vmem>>, %arg9: memref<1x32xf32, #tpu.memory_space<vmem>>, %arg10: memref<1x8x32xf32, #tpu.memory_space<vmem>>, %arg11: memref<16x32xbf16, #tpu.memory_space<vmem>>, %arg12: memref<16x32xbf16, #tpu.memory_space<vmem>>, %arg13: memref<8x32xf32, #tpu.memory_space<vmem>>) attributes {dimension_semantics = [#tpu.dimension_semantics<parallel>, #tpu.dimension_semantics<arbitrary>], iteration_bounds = array<i64: 2, 2>, scalar_prefetch = 0 : i64, scratch_operands = 3 : i64, tpu.core_type = #tpu.core_type<tc>, window_params = [{transform_indices = @transform_0, window_bounds = array<i64: 1, 8, 32>}, {transform_indices = @transform_1, window_bounds = array<i64: 1, 16, 32>}, {transform_indices = @transform_2, window_bounds = array<i64: 1, 16, 32>}, {pipeline_mode = #tpu.pipeline_mode<synchronous>, transform_indices = @transform_3, window_bounds = array<i64: 32, 32>}, {pipeline_mode = #tpu.pipeline_mode<synchronous>, transform_indices = @transform_4, window_bounds = array<i64: 32, 32>}, {pipeline_mode = #tpu.pipeline_mode<synchronous>, transform_indices = @transform_5, window_bounds = array<i64: 32, 32>}, {pipeline_mode = #tpu.pipeline_mode<synchronous>, transform_indices = @transform_6, window_bounds = array<i64: 32, 32>}, {pipeline_mode = #tpu.pipeline_mode<synchronous>, transform_indices = @transform_7, window_bounds = array<i64: 1, 32>}, {transform_indices = @transform_8, window_bounds = array<i64: 1, 8, 32>}]} {
    %c0_i32 = arith.constant 0 : i32
    %0 = arith.cmpi eq, %arg1, %c0_i32 : i32
    %1 = arith.extui %0 : i1 to i32
    %c0_i32_0 = arith.constant 0 : i32
    %2 = arith.cmpi ne, %1, %c0_i32_0 : i32
    scf.if %2 {
      %c0_89 = arith.constant 0 : index
      %c0_90 = arith.constant 0 : index
      %c0_91 = arith.constant 0 : index
      %157 = vector.load %arg3[%c0_89, %c0_90, %c0_91] : memref<1x16x32xf32, #tpu.memory_space<vmem>>, vector<1x16x32xf32>
      %158 = vector.shape_cast %157 : vector<1x16x32xf32> to vector<16x32xf32>
      %159 = arith.truncf %158 : vector<16x32xf32> to vector<16x32xbf16>
      %c0_92 = arith.constant 0 : index
      %c0_93 = arith.constant 0 : index
      %160 = vector.load %arg6[%c0_92, %c0_93] : memref<32x32xbf16, #tpu.memory_space<vmem>>, vector<32x32xbf16>
      %cst_94 = arith.constant dense<0.000000e+00> : vector<16x32xf32>
      %161 = tpu.matmul %159, %160, %cst_94 {dimension_numbers = #tpu.dot_dimension_numbers<[1], [0], [0], [1], [0, 0, 1, 1], [], []>} : vector<16x32xbf16>, vector<32x32xbf16>, vector<16x32xf32> -> vector<16x32xf32>
      %162 = arith.truncf %161 : vector<16x32xf32> to vector<16x32xbf16>
      %c0_95 = arith.constant 0 : index
      %c0_96 = arith.constant 0 : index
      %163 = vector.load %arg11[%c0_95, %c0_96] : memref<16x32xbf16, #tpu.memory_space<vmem>>, vector<16x32xbf16>
      tpu.vector_store %arg11[%c0_95, %c0_96], %162 {strides = array<i32>} : memref<16x32xbf16, #tpu.memory_space<vmem>>, vector<16x32xbf16>,
      %c0_97 = arith.constant 0 : index
      %c0_98 = arith.constant 0 : index
      %c0_99 = arith.constant 0 : index
      %164 = vector.load %arg4[%c0_97, %c0_98, %c0_99] : memref<1x16x32xf32, #tpu.memory_space<vmem>>, vector<1x16x32xf32>
      %165 = vector.shape_cast %164 : vector<1x16x32xf32> to vector<16x32xf32>
      %166 = arith.addf %158, %165 : vector<16x32xf32>
      %167 = arith.truncf %166 : vector<16x32xf32> to vector<16x32xbf16>
      %c0_100 = arith.constant 0 : index
      %c0_101 = arith.constant 0 : index
      %168 = vector.load %arg7[%c0_100, %c0_101] : memref<32x32xbf16, #tpu.memory_space<vmem>>, vector<32x32xbf16>
      %cst_102 = arith.constant dense<0.000000e+00> : vector<16x32xf32>
      %169 = tpu.matmul %167, %168, %cst_102 {dimension_numbers = #tpu.dot_dimension_numbers<[1], [0], [0], [1], [0, 0, 1, 1], [], []>} : vector<16x32xbf16>, vector<32x32xbf16>, vector<16x32xf32> -> vector<16x32xf32>
      %170 = arith.truncf %169 : vector<16x32xf32> to vector<16x32xbf16>
      %c0_103 = arith.constant 0 : index
      %c0_104 = arith.constant 0 : index
      %171 = vector.load %arg12[%c0_103, %c0_104] : memref<16x32xbf16, #tpu.memory_space<vmem>>, vector<16x32xbf16>
      tpu.vector_store %arg12[%c0_103, %c0_104], %170 {strides = array<i32>} : memref<16x32xbf16, #tpu.memory_space<vmem>>, vector<16x32xbf16>,
    } else {
    }
    %c0 = arith.constant 0 : index
    %c0_1 = arith.constant 0 : index
    %c0_2 = arith.constant 0 : index
    %3 = vector.load %arg2[%c0, %c0_1, %c0_2] : memref<1x8x32xf32, #tpu.memory_space<vmem>>, vector<1x8x32xf32>
    %4 = vector.shape_cast %3 : vector<1x8x32xf32> to vector<8x32xf32>
    %5 = arith.truncf %4 : vector<8x32xf32> to vector<8x32xbf16>
    %c0_3 = arith.constant 0 : index
    %c0_4 = arith.constant 0 : index
    %6 = vector.load %arg5[%c0_3, %c0_4] : memref<32x32xbf16, #tpu.memory_space<vmem>>, vector<32x32xbf16>
    %cst = arith.constant dense<0.000000e+00> : vector<8x32xf32>
    %7 = tpu.matmul %5, %6, %cst {dimension_numbers = #tpu.dot_dimension_numbers<[1], [0], [0], [1], [0, 0, 1, 1], [], []>} : vector<8x32xbf16>, vector<32x32xbf16>, vector<8x32xf32> -> vector<8x32xf32>
    %cst_5 = arith.constant 5.000000e-01 : f32
    %8 = vector.broadcast %cst_5 : f32 to vector<8x32xf32>
    %9 = arith.mulf %7, %8 : vector<8x32xf32>
    %10 = arith.truncf %9 : vector<8x32xf32> to vector<8x32xbf16>
    %11 = vector.extract_strided_slice %10 {offsets = [0, 0], sizes = [8, 4], strides = [1, 1]} : vector<8x32xbf16> to vector<8x4xbf16>
    %c0_6 = arith.constant 0 : index
    %c0_7 = arith.constant 0 : index
    %12 = vector.load %arg11[%c0_6, %c0_7] : memref<16x32xbf16, #tpu.memory_space<vmem>>, vector<16x4xbf16>
    %c0_8 = arith.constant 0 : index
    %c0_9 = arith.constant 0 : index
    %13 = vector.load %arg12[%c0_8, %c0_9] : memref<16x32xbf16, #tpu.memory_space<vmem>>, vector<16x4xbf16>
    %cst_10 = arith.constant dense<0.000000e+00> : vector<8x16xf32>
    %14 = tpu.matmul %11, %12, %cst_10 {dimension_numbers = #tpu.dot_dimension_numbers<[1], [1], [0], [0], [0, 0, 1, 0], [], []>} : vector<8x4xbf16>, vector<16x4xbf16>, vector<8x16xf32> -> vector<8x16xf32>
    %cst_11 = arith.constant dense<0xFF800000> : vector<8xf32>
    %15 = vector.multi_reduction <maximumf>, %14, %cst_11 [1] : vector<8x16xf32> to vector<8xf32>
    %16 = vector.shape_cast %15 : vector<8xf32> to vector<8x1xf32>
    %17 = vector.broadcast %16 : vector<8x1xf32> to vector<8x16xf32>
    %18 = arith.subf %14, %17 : vector<8x16xf32>
    %19 = math.exp %18 : vector<8x16xf32>
    %cst_12 = arith.constant dense<0.000000e+00> : vector<8xf32>
    %20 = vector.multi_reduction <add>, %19, %cst_12 [1] : vector<8x16xf32> to vector<8xf32>
    %21 = vector.shape_cast %20 : vector<8xf32> to vector<8x1xf32>
    %22 = tpu.reciprocal %21 {approx = true} : vector<8x1xf32> -> vector<8x1xf32>
    %23 = vector.broadcast %22 : vector<8x1xf32> to vector<8x16xf32>
    %24 = arith.mulf %19, %23 : vector<8x16xf32>
    %25 = arith.truncf %24 : vector<8x16xf32> to vector<8x16xbf16>
    %cst_13 = arith.constant dense<0.000000e+00> : vector<8x4xf32>
    %26 = tpu.matmul %25, %13, %cst_13 {dimension_numbers = #tpu.dot_dimension_numbers<[1], [0], [0], [1], [0, 0, 1, 1], [], []>} : vector<8x16xbf16>, vector<16x4xbf16>, vector<8x4xf32> -> vector<8x4xf32>
    %c0_14 = arith.constant 0 : index
    %c0_15 = arith.constant 0 : index
    %27 = vector.load %arg13[%c0_14, %c0_15] : memref<8x32xf32, #tpu.memory_space<vmem>>, vector<8x4xf32>
    tpu.vector_store %arg13[%c0_14, %c0_15], %26 {strides = array<i32>} : memref<8x32xf32, #tpu.memory_space<vmem>>, vector<8x4xf32>,
    %28 = vector.extract_strided_slice %10 {offsets = [0, 4], sizes = [8, 4], strides = [1, 1]} : vector<8x32xbf16> to vector<8x4xbf16>
    %c0_16 = arith.constant 0 : index
    %c4 = arith.constant 4 : index
    %29 = vector.load %arg11[%c0_16, %c4] : memref<16x32xbf16, #tpu.memory_space<vmem>>, vector<16x4xbf16>
    %c0_17 = arith.constant 0 : index
    %c4_18 = arith.constant 4 : index
    %30 = vector.load %arg12[%c0_17, %c4_18] : memref<16x32xbf16, #tpu.memory_space<vmem>>, vector<16x4xbf16>
    %cst_19 = arith.constant dense<0.000000e+00> : vector<8x16xf32>
    %31 = tpu.matmul %28, %29, %cst_19 {dimension_numbers = #tpu.dot_dimension_numbers<[1], [1], [0], [0], [0, 0, 1, 0], [], []>} : vector<8x4xbf16>, vector<16x4xbf16>, vector<8x16xf32> -> vector<8x16xf32>
    %cst_20 = arith.constant dense<0xFF800000> : vector<8xf32>
    %32 = vector.multi_reduction <maximumf>, %31, %cst_20 [1] : vector<8x16xf32> to vector<8xf32>
    %33 = vector.shape_cast %32 : vector<8xf32> to vector<8x1xf32>
    %34 = vector.broadcast %33 : vector<8x1xf32> to vector<8x16xf32>
    %35 = arith.subf %31, %34 : vector<8x16xf32>
    %36 = math.exp %35 : vector<8x16xf32>
    %cst_21 = arith.constant dense<0.000000e+00> : vector<8xf32>
    %37 = vector.multi_reduction <add>, %36, %cst_21 [1] : vector<8x16xf32> to vector<8xf32>
    %38 = vector.shape_cast %37 : vector<8xf32> to vector<8x1xf32>
    %39 = tpu.reciprocal %38 {approx = true} : vector<8x1xf32> -> vector<8x1xf32>
    %40 = vector.broadcast %39 : vector<8x1xf32> to vector<8x16xf32>
    %41 = arith.mulf %36, %40 : vector<8x16xf32>
    %42 = arith.truncf %41 : vector<8x16xf32> to vector<8x16xbf16>
    %cst_22 = arith.constant dense<0.000000e+00> : vector<8x4xf32>
    %43 = tpu.matmul %42, %30, %cst_22 {dimension_numbers = #tpu.dot_dimension_numbers<[1], [0], [0], [1], [0, 0, 1, 1], [], []>} : vector<8x16xbf16>, vector<16x4xbf16>, vector<8x4xf32> -> vector<8x4xf32>
    %c0_23 = arith.constant 0 : index
    %c4_24 = arith.constant 4 : index
    %44 = vector.load %arg13[%c0_23, %c4_24] : memref<8x32xf32, #tpu.memory_space<vmem>>, vector<8x4xf32>
    tpu.vector_store %arg13[%c0_23, %c4_24], %43 {strides = array<i32>} : memref<8x32xf32, #tpu.memory_space<vmem>>, vector<8x4xf32>,
    %45 = vector.extract_strided_slice %10 {offsets = [0, 8], sizes = [8, 4], strides = [1, 1]} : vector<8x32xbf16> to vector<8x4xbf16>
    %c0_25 = arith.constant 0 : index
    %c8 = arith.constant 8 : index
    %46 = vector.load %arg11[%c0_25, %c8] : memref<16x32xbf16, #tpu.memory_space<vmem>>, vector<16x4xbf16>
    %c0_26 = arith.constant 0 : index
    %c8_27 = arith.constant 8 : index
    %47 = vector.load %arg12[%c0_26, %c8_27] : memref<16x32xbf16, #tpu.memory_space<vmem>>, vector<16x4xbf16>
    %cst_28 = arith.constant dense<0.000000e+00> : vector<8x16xf32>
    %48 = tpu.matmul %45, %46, %cst_28 {dimension_numbers = #tpu.dot_dimension_numbers<[1], [1], [0], [0], [0, 0, 1, 0], [], []>} : vector<8x4xbf16>, vector<16x4xbf16>, vector<8x16xf32> -> vector<8x16xf32>
    %cst_29 = arith.constant dense<0xFF800000> : vector<8xf32>
    %49 = vector.multi_reduction <maximumf>, %48, %cst_29 [1] : vector<8x16xf32> to vector<8xf32>
    %50 = vector.shape_cast %49 : vector<8xf32> to vector<8x1xf32>
    %51 = vector.broadcast %50 : vector<8x1xf32> to vector<8x16xf32>
    %52 = arith.subf %48, %51 : vector<8x16xf32>
    %53 = math.exp %52 : vector<8x16xf32>
    %cst_30 = arith.constant dense<0.000000e+00> : vector<8xf32>
    %54 = vector.multi_reduction <add>, %53, %cst_30 [1] : vector<8x16xf32> to vector<8xf32>
    %55 = vector.shape_cast %54 : vector<8xf32> to vector<8x1xf32>
    %56 = tpu.reciprocal %55 {approx = true} : vector<8x1xf32> -> vector<8x1xf32>
    %57 = vector.broadcast %56 : vector<8x1xf32> to vector<8x16xf32>
    %58 = arith.mulf %53, %57 : vector<8x16xf32>
    %59 = arith.truncf %58 : vector<8x16xf32> to vector<8x16xbf16>
    %cst_31 = arith.constant dense<0.000000e+00> : vector<8x4xf32>
    %60 = tpu.matmul %59, %47, %cst_31 {dimension_numbers = #tpu.dot_dimension_numbers<[1], [0], [0], [1], [0, 0, 1, 1], [], []>} : vector<8x16xbf16>, vector<16x4xbf16>, vector<8x4xf32> -> vector<8x4xf32>
    %c0_32 = arith.constant 0 : index
    %c8_33 = arith.constant 8 : index
    %61 = vector.load %arg13[%c0_32, %c8_33] : memref<8x32xf32, #tpu.memory_space<vmem>>, vector<8x4xf32>
    tpu.vector_store %arg13[%c0_32, %c8_33], %60 {strides = array<i32>} : memref<8x32xf32, #tpu.memory_space<vmem>>, vector<8x4xf32>,
    %62 = vector.extract_strided_slice %10 {offsets = [0, 12], sizes = [8, 4], strides = [1, 1]} : vector<8x32xbf16> to vector<8x4xbf16>
    %c0_34 = arith.constant 0 : index
    %c12 = arith.constant 12 : index
    %63 = vector.load %arg11[%c0_34, %c12] : memref<16x32xbf16, #tpu.memory_space<vmem>>, vector<16x4xbf16>
    %c0_35 = arith.constant 0 : index
    %c12_36 = arith.constant 12 : index
    %64 = vector.load %arg12[%c0_35, %c12_36] : memref<16x32xbf16, #tpu.memory_space<vmem>>, vector<16x4xbf16>
    %cst_37 = arith.constant dense<0.000000e+00> : vector<8x16xf32>
    %65 = tpu.matmul %62, %63, %cst_37 {dimension_numbers = #tpu.dot_dimension_numbers<[1], [1], [0], [0], [0, 0, 1, 0], [], []>} : vector<8x4xbf16>, vector<16x4xbf16>, vector<8x16xf32> -> vector<8x16xf32>
    %cst_38 = arith.constant dense<0xFF800000> : vector<8xf32>
    %66 = vector.multi_reduction <maximumf>, %65, %cst_38 [1] : vector<8x16xf32> to vector<8xf32>
    %67 = vector.shape_cast %66 : vector<8xf32> to vector<8x1xf32>
    %68 = vector.broadcast %67 : vector<8x1xf32> to vector<8x16xf32>
    %69 = arith.subf %65, %68 : vector<8x16xf32>
    %70 = math.exp %69 : vector<8x16xf32>
    %cst_39 = arith.constant dense<0.000000e+00> : vector<8xf32>
    %71 = vector.multi_reduction <add>, %70, %cst_39 [1] : vector<8x16xf32> to vector<8xf32>
    %72 = vector.shape_cast %71 : vector<8xf32> to vector<8x1xf32>
    %73 = tpu.reciprocal %72 {approx = true} : vector<8x1xf32> -> vector<8x1xf32>
    %74 = vector.broadcast %73 : vector<8x1xf32> to vector<8x16xf32>
    %75 = arith.mulf %70, %74 : vector<8x16xf32>
    %76 = arith.truncf %75 : vector<8x16xf32> to vector<8x16xbf16>
    %cst_40 = arith.constant dense<0.000000e+00> : vector<8x4xf32>
    %77 = tpu.matmul %76, %64, %cst_40 {dimension_numbers = #tpu.dot_dimension_numbers<[1], [0], [0], [1], [0, 0, 1, 1], [], []>} : vector<8x16xbf16>, vector<16x4xbf16>, vector<8x4xf32> -> vector<8x4xf32>
    %c0_41 = arith.constant 0 : index
    %c12_42 = arith.constant 12 : index
    %78 = vector.load %arg13[%c0_41, %c12_42] : memref<8x32xf32, #tpu.memory_space<vmem>>, vector<8x4xf32>
    tpu.vector_store %arg13[%c0_41, %c12_42], %77 {strides = array<i32>} : memref<8x32xf32, #tpu.memory_space<vmem>>, vector<8x4xf32>,
    %79 = vector.extract_strided_slice %10 {offsets = [0, 16], sizes = [8, 4], strides = [1, 1]} : vector<8x32xbf16> to vector<8x4xbf16>
    %c0_43 = arith.constant 0 : index
    %c16 = arith.constant 16 : index
    %80 = vector.load %arg11[%c0_43, %c16] : memref<16x32xbf16, #tpu.memory_space<vmem>>, vector<16x4xbf16>
    %c0_44 = arith.constant 0 : index
    %c16_45 = arith.constant 16 : index
    %81 = vector.load %arg12[%c0_44, %c16_45] : memref<16x32xbf16, #tpu.memory_space<vmem>>, vector<16x4xbf16>
    %cst_46 = arith.constant dense<0.000000e+00> : vector<8x16xf32>
    %82 = tpu.matmul %79, %80, %cst_46 {dimension_numbers = #tpu.dot_dimension_numbers<[1], [1], [0], [0], [0, 0, 1, 0], [], []>} : vector<8x4xbf16>, vector<16x4xbf16>, vector<8x16xf32> -> vector<8x16xf32>
    %cst_47 = arith.constant dense<0xFF800000> : vector<8xf32>
    %83 = vector.multi_reduction <maximumf>, %82, %cst_47 [1] : vector<8x16xf32> to vector<8xf32>
    %84 = vector.shape_cast %83 : vector<8xf32> to vector<8x1xf32>
    %85 = vector.broadcast %84 : vector<8x1xf32> to vector<8x16xf32>
    %86 = arith.subf %82, %85 : vector<8x16xf32>
    %87 = math.exp %86 : vector<8x16xf32>
    %cst_48 = arith.constant dense<0.000000e+00> : vector<8xf32>
    %88 = vector.multi_reduction <add>, %87, %cst_48 [1] : vector<8x16xf32> to vector<8xf32>
    %89 = vector.shape_cast %88 : vector<8xf32> to vector<8x1xf32>
    %90 = tpu.reciprocal %89 {approx = true} : vector<8x1xf32> -> vector<8x1xf32>
    %91 = vector.broadcast %90 : vector<8x1xf32> to vector<8x16xf32>
    %92 = arith.mulf %87, %91 : vector<8x16xf32>
    %93 = arith.truncf %92 : vector<8x16xf32> to vector<8x16xbf16>
    %cst_49 = arith.constant dense<0.000000e+00> : vector<8x4xf32>
    %94 = tpu.matmul %93, %81, %cst_49 {dimension_numbers = #tpu.dot_dimension_numbers<[1], [0], [0], [1], [0, 0, 1, 1], [], []>} : vector<8x16xbf16>, vector<16x4xbf16>, vector<8x4xf32> -> vector<8x4xf32>
    %c0_50 = arith.constant 0 : index
    %c16_51 = arith.constant 16 : index
    %95 = vector.load %arg13[%c0_50, %c16_51] : memref<8x32xf32, #tpu.memory_space<vmem>>, vector<8x4xf32>
    tpu.vector_store %arg13[%c0_50, %c16_51], %94 {strides = array<i32>} : memref<8x32xf32, #tpu.memory_space<vmem>>, vector<8x4xf32>,
    %96 = vector.extract_strided_slice %10 {offsets = [0, 20], sizes = [8, 4], strides = [1, 1]} : vector<8x32xbf16> to vector<8x4xbf16>
    %c0_52 = arith.constant 0 : index
    %c20 = arith.constant 20 : index
    %97 = vector.load %arg11[%c0_52, %c20] : memref<16x32xbf16, #tpu.memory_space<vmem>>, vector<16x4xbf16>
    %c0_53 = arith.constant 0 : index
    %c20_54 = arith.constant 20 : index
    %98 = vector.load %arg12[%c0_53, %c20_54] : memref<16x32xbf16, #tpu.memory_space<vmem>>, vector<16x4xbf16>
    %cst_55 = arith.constant dense<0.000000e+00> : vector<8x16xf32>
    %99 = tpu.matmul %96, %97, %cst_55 {dimension_numbers = #tpu.dot_dimension_numbers<[1], [1], [0], [0], [0, 0, 1, 0], [], []>} : vector<8x4xbf16>, vector<16x4xbf16>, vector<8x16xf32> -> vector<8x16xf32>
    %cst_56 = arith.constant dense<0xFF800000> : vector<8xf32>
    %100 = vector.multi_reduction <maximumf>, %99, %cst_56 [1] : vector<8x16xf32> to vector<8xf32>
    %101 = vector.shape_cast %100 : vector<8xf32> to vector<8x1xf32>
    %102 = vector.broadcast %101 : vector<8x1xf32> to vector<8x16xf32>
    %103 = arith.subf %99, %102 : vector<8x16xf32>
    %104 = math.exp %103 : vector<8x16xf32>
    %cst_57 = arith.constant dense<0.000000e+00> : vector<8xf32>
    %105 = vector.multi_reduction <add>, %104, %cst_57 [1] : vector<8x16xf32> to vector<8xf32>
    %106 = vector.shape_cast %105 : vector<8xf32> to vector<8x1xf32>
    %107 = tpu.reciprocal %106 {approx = true} : vector<8x1xf32> -> vector<8x1xf32>
    %108 = vector.broadcast %107 : vector<8x1xf32> to vector<8x16xf32>
    %109 = arith.mulf %104, %108 : vector<8x16xf32>
    %110 = arith.truncf %109 : vector<8x16xf32> to vector<8x16xbf16>
    %cst_58 = arith.constant dense<0.000000e+00> : vector<8x4xf32>
    %111 = tpu.matmul %110, %98, %cst_58 {dimension_numbers = #tpu.dot_dimension_numbers<[1], [0], [0], [1], [0, 0, 1, 1], [], []>} : vector<8x16xbf16>, vector<16x4xbf16>, vector<8x4xf32> -> vector<8x4xf32>
    %c0_59 = arith.constant 0 : index
    %c20_60 = arith.constant 20 : index
    %112 = vector.load %arg13[%c0_59, %c20_60] : memref<8x32xf32, #tpu.memory_space<vmem>>, vector<8x4xf32>
    tpu.vector_store %arg13[%c0_59, %c20_60], %111 {strides = array<i32>} : memref<8x32xf32, #tpu.memory_space<vmem>>, vector<8x4xf32>,
    %113 = vector.extract_strided_slice %10 {offsets = [0, 24], sizes = [8, 4], strides = [1, 1]} : vector<8x32xbf16> to vector<8x4xbf16>
    %c0_61 = arith.constant 0 : index
    %c24 = arith.constant 24 : index
    %114 = vector.load %arg11[%c0_61, %c24] : memref<16x32xbf16, #tpu.memory_space<vmem>>, vector<16x4xbf16>
    %c0_62 = arith.constant 0 : index
    %c24_63 = arith.constant 24 : index
    %115 = vector.load %arg12[%c0_62, %c24_63] : memref<16x32xbf16, #tpu.memory_space<vmem>>, vector<16x4xbf16>
    %cst_64 = arith.constant dense<0.000000e+00> : vector<8x16xf32>
    %116 = tpu.matmul %113, %114, %cst_64 {dimension_numbers = #tpu.dot_dimension_numbers<[1], [1], [0], [0], [0, 0, 1, 0], [], []>} : vector<8x4xbf16>, vector<16x4xbf16>, vector<8x16xf32> -> vector<8x16xf32>
    %cst_65 = arith.constant dense<0xFF800000> : vector<8xf32>
    %117 = vector.multi_reduction <maximumf>, %116, %cst_65 [1] : vector<8x16xf32> to vector<8xf32>
    %118 = vector.shape_cast %117 : vector<8xf32> to vector<8x1xf32>
    %119 = vector.broadcast %118 : vector<8x1xf32> to vector<8x16xf32>
    %120 = arith.subf %116, %119 : vector<8x16xf32>
    %121 = math.exp %120 : vector<8x16xf32>
    %cst_66 = arith.constant dense<0.000000e+00> : vector<8xf32>
    %122 = vector.multi_reduction <add>, %121, %cst_66 [1] : vector<8x16xf32> to vector<8xf32>
    %123 = vector.shape_cast %122 : vector<8xf32> to vector<8x1xf32>
    %124 = tpu.reciprocal %123 {approx = true} : vector<8x1xf32> -> vector<8x1xf32>
    %125 = vector.broadcast %124 : vector<8x1xf32> to vector<8x16xf32>
    %126 = arith.mulf %121, %125 : vector<8x16xf32>
    %127 = arith.truncf %126 : vector<8x16xf32> to vector<8x16xbf16>
    %cst_67 = arith.constant dense<0.000000e+00> : vector<8x4xf32>
    %128 = tpu.matmul %127, %115, %cst_67 {dimension_numbers = #tpu.dot_dimension_numbers<[1], [0], [0], [1], [0, 0, 1, 1], [], []>} : vector<8x16xbf16>, vector<16x4xbf16>, vector<8x4xf32> -> vector<8x4xf32>
    %c0_68 = arith.constant 0 : index
    %c24_69 = arith.constant 24 : index
    %129 = vector.load %arg13[%c0_68, %c24_69] : memref<8x32xf32, #tpu.memory_space<vmem>>, vector<8x4xf32>
    tpu.vector_store %arg13[%c0_68, %c24_69], %128 {strides = array<i32>} : memref<8x32xf32, #tpu.memory_space<vmem>>, vector<8x4xf32>,
    %130 = vector.extract_strided_slice %10 {offsets = [0, 28], sizes = [8, 4], strides = [1, 1]} : vector<8x32xbf16> to vector<8x4xbf16>
    %c0_70 = arith.constant 0 : index
    %c28 = arith.constant 28 : index
    %131 = vector.load %arg11[%c0_70, %c28] : memref<16x32xbf16, #tpu.memory_space<vmem>>, vector<16x4xbf16>
    %c0_71 = arith.constant 0 : index
    %c28_72 = arith.constant 28 : index
    %132 = vector.load %arg12[%c0_71, %c28_72] : memref<16x32xbf16, #tpu.memory_space<vmem>>, vector<16x4xbf16>
    %cst_73 = arith.constant dense<0.000000e+00> : vector<8x16xf32>
    %133 = tpu.matmul %130, %131, %cst_73 {dimension_numbers = #tpu.dot_dimension_numbers<[1], [1], [0], [0], [0, 0, 1, 0], [], []>} : vector<8x4xbf16>, vector<16x4xbf16>, vector<8x16xf32> -> vector<8x16xf32>
    %cst_74 = arith.constant dense<0xFF800000> : vector<8xf32>
    %134 = vector.multi_reduction <maximumf>, %133, %cst_74 [1] : vector<8x16xf32> to vector<8xf32>
    %135 = vector.shape_cast %134 : vector<8xf32> to vector<8x1xf32>
    %136 = vector.broadcast %135 : vector<8x1xf32> to vector<8x16xf32>
    %137 = arith.subf %133, %136 : vector<8x16xf32>
    %138 = math.exp %137 : vector<8x16xf32>
    %cst_75 = arith.constant dense<0.000000e+00> : vector<8xf32>
    %139 = vector.multi_reduction <add>, %138, %cst_75 [1] : vector<8x16xf32> to vector<8xf32>
    %140 = vector.shape_cast %139 : vector<8xf32> to vector<8x1xf32>
    %141 = tpu.reciprocal %140 {approx = true} : vector<8x1xf32> -> vector<8x1xf32>
    %142 = vector.broadcast %141 : vector<8x1xf32> to vector<8x16xf32>
    %143 = arith.mulf %138, %142 : vector<8x16xf32>
    %144 = arith.truncf %143 : vector<8x16xf32> to vector<8x16xbf16>
    %cst_76 = arith.constant dense<0.000000e+00> : vector<8x4xf32>
    %145 = tpu.matmul %144, %132, %cst_76 {dimension_numbers = #tpu.dot_dimension_numbers<[1], [0], [0], [1], [0, 0, 1, 1], [], []>} : vector<8x16xbf16>, vector<16x4xbf16>, vector<8x4xf32> -> vector<8x4xf32>
    %c0_77 = arith.constant 0 : index
    %c28_78 = arith.constant 28 : index
    %146 = vector.load %arg13[%c0_77, %c28_78] : memref<8x32xf32, #tpu.memory_space<vmem>>, vector<8x4xf32>
    tpu.vector_store %arg13[%c0_77, %c28_78], %145 {strides = array<i32>} : memref<8x32xf32, #tpu.memory_space<vmem>>, vector<8x4xf32>,
    %c0_79 = arith.constant 0 : index
    %c0_80 = arith.constant 0 : index
    %147 = vector.load %arg13[%c0_79, %c0_80] : memref<8x32xf32, #tpu.memory_space<vmem>>, vector<8x32xf32>
    %148 = arith.truncf %147 : vector<8x32xf32> to vector<8x32xbf16>
    %c0_81 = arith.constant 0 : index
    %c0_82 = arith.constant 0 : index
    %149 = vector.load %arg8[%c0_81, %c0_82] : memref<32x32xbf16, #tpu.memory_space<vmem>>, vector<32x32xbf16>
    %cst_83 = arith.constant dense<0.000000e+00> : vector<8x32xf32>
    %150 = tpu.matmul %148, %149, %cst_83 {dimension_numbers = #tpu.dot_dimension_numbers<[1], [0], [0], [1], [0, 0, 1, 1], [], []>} : vector<8x32xbf16>, vector<32x32xbf16>, vector<8x32xf32> -> vector<8x32xf32>
    %c0_84 = arith.constant 0 : index
    %c0_85 = arith.constant 0 : index
    %151 = vector.load %arg9[%c0_84, %c0_85] : memref<1x32xf32, #tpu.memory_space<vmem>>, vector<1x32xf32>
    %152 = vector.broadcast %151 : vector<1x32xf32> to vector<8x32xf32>
    %153 = arith.addf %150, %152 : vector<8x32xf32>
    %c0_86 = arith.constant 0 : index
    %c0_87 = arith.constant 0 : index
    %c0_88 = arith.constant 0 : index
    %154 = vector.load %arg10[%c0_86, %c0_87, %c0_88] : memref<1x8x32xf32, #tpu.memory_space<vmem>>, vector<1x8x32xf32>
    %155 = vector.shape_cast %154 : vector<1x8x32xf32> to vector<8x32xf32>
    %156 = vector.shape_cast %153 : vector<8x32xf32> to vector<1x8x32xf32>
    tpu.vector_store %arg10[%c0_86, %c0_87, %c0_88], %156 {strides = array<i32>} : memref<1x8x32xf32, #tpu.memory_space<vmem>>, vector<1x8x32xf32>,
    return
  }
  func.func @transform_0(%arg0: i32, %arg1: i32) -> (i32, i32, i32) {
    %c0_i32 = arith.constant 0 : i32
    %c0_i32_0 = arith.constant 0 : i32
    return %arg0, %arg1, %c0_i32 : i32, i32, i32
  }
  func.func @transform_1(%arg0: i32, %arg1: i32) -> (i32, i32, i32) {
    %c0_i32 = arith.constant 0 : i32
    %c0_i32_0 = arith.constant 0 : i32
    %c0_i32_1 = arith.constant 0 : i32
    return %arg0, %c0_i32, %c0_i32_0 : i32, i32, i32
  }
  func.func @transform_2(%arg0: i32, %arg1: i32) -> (i32, i32, i32) {
    %c0_i32 = arith.constant 0 : i32
    %c0_i32_0 = arith.constant 0 : i32
    %c0_i32_1 = arith.constant 0 : i32
    return %arg0, %c0_i32, %c0_i32_0 : i32, i32, i32
  }
  func.func @transform_3(%arg0: i32, %arg1: i32) -> (i32, i32) {
    %c0_i32 = arith.constant 0 : i32
    %c0_i32_0 = arith.constant 0 : i32
    %c0_i32_1 = arith.constant 0 : i32
    return %c0_i32, %c0_i32_0 : i32, i32
  }
  func.func @transform_4(%arg0: i32, %arg1: i32) -> (i32, i32) {
    %c0_i32 = arith.constant 0 : i32
    %c0_i32_0 = arith.constant 0 : i32
    %c0_i32_1 = arith.constant 0 : i32
    return %c0_i32, %c0_i32_0 : i32, i32
  }
  func.func @transform_5(%arg0: i32, %arg1: i32) -> (i32, i32) {
    %c0_i32 = arith.constant 0 : i32
    %c0_i32_0 = arith.constant 0 : i32
    %c0_i32_1 = arith.constant 0 : i32
    return %c0_i32, %c0_i32_0 : i32, i32
  }
  func.func @transform_6(%arg0: i32, %arg1: i32) -> (i32, i32) {
    %c0_i32 = arith.constant 0 : i32
    %c0_i32_0 = arith.constant 0 : i32
    %c0_i32_1 = arith.constant 0 : i32
    return %c0_i32, %c0_i32_0 : i32, i32
  }
  func.func @transform_7(%arg0: i32, %arg1: i32) -> (i32, i32) {
    %c0_i32 = arith.constant 0 : i32
    %c0_i32_0 = arith.constant 0 : i32
    %c0_i32_1 = arith.constant 0 : i32
    return %c0_i32, %c0_i32_0 : i32, i32
  }
  func.func @transform_8(%arg0: i32, %arg1: i32) -> (i32, i32, i32) {
    %c0_i32 = arith.constant 0 : i32
    %c0_i32_0 = arith.constant 0 : i32
    return %arg0, %arg1, %c0_i32 : i32, i32, i32
  }
}

</mosaic_0001>

<bundles_post_ra>
// kernel: tpu_custom_call.1
= control target key start
LH: loop header
LB: loop body
LE: loop exit
PB: predicated region body
PF: predicated region fallthrough
CT: control target
= control target key end

     0   :  { %s3376_s0 = inlined_call_operand.hbm [shape: f32[2,16,32], index: 0, kind: input, shape index: {}]   ;;  %s3377_s1 = inlined_call_operand.hbm [shape: f32[2,16,32], index: 1, kind: input, shape index: {}]   ;;  %s3378_s2 = inlined_call_operand.hbm [shape: f32[2,16,32], index: 2, kind: input, shape index: {}]   ;;  %s3379_s3 = inlined_call_operand.hbm [shape: bf16[32,32], index: 3, kind: input, shape index: {}]   ;;  %s3380_s4 = inlined_call_operand.hbm [shape: bf16[32,32], index: 4, kind: input, shape index: {}]   ;;  %s3381_s5 = inlined_call_operand.hbm [shape: bf16[32,32], index: 5, kind: input, shape index: {}]   ;;  %s3382_s6 = inlined_call_operand.hbm [shape: bf16[32,32], index: 6, kind: input, shape index: {}]   ;;  %s3383_s7 = inlined_call_operand.vmem [shape: f32[1,32], index: 7, kind: input, shape index: {}]   ;;  %s3384_s8 = inlined_call_operand.hbm [shape: f32[2,16,32], index: 8, kind: output, shape index: {}]  }
   0x1   :  { %3404 = sst [smem:[#allocation30_spill]] %s3377_s1 }
   0x2   :  { %3405 = sst [smem:[#allocation31_spill]] %s3378_s2 }
   0x3   :  { %3406 = sst [smem:[#allocation32_spill]] %s3379_s3 }
   0x4   :  { %3407 = sst [smem:[#allocation33_spill]] %s3380_s4 }
   0x5   :  { %3408 = sst [smem:[#allocation34_spill]] %s3381_s5 }
   0x6   :  { %3409 = sst [smem:[#allocation35_spill]] %s3382_s6 }
   0x7   :  { %3410 = sst [smem:[#allocation36_spill]] %s3383_s7 }
   0x8   :  { %3411 = sst [smem:[#allocation37_spill]] %s3384_s8 }
   0x9   :  { %13 = vsyncpa [#allocation6], 0 }
   0xa   :  { %15 = vsyncpa [#allocation6 + $0x1], 0 }
   0xb   :  { %16 = vsyncpa [#allocation9], 0 }
   0xc   :  { %18 = vsyncpa [#allocation9 + $0x1], 0 }
   0xd   :  { %19 = vsyncpa [#allocation12], 0 }
   0xe   :  { %20 = vsyncpa [#allocation15], 0 }
   0xf   :  { %21 = vsyncpa [#allocation7], 0 }
  0x10   :  { %23 = vsyncpa [#allocation7 + $0x1], 0  ;;  %s2847_s27 = smov 0   ;;  %s2849_s28 = smov 0  }
  0x11   :  { %s2851_s29 = smov 0   ;;  %s2853_s30 = smov 0  }
  0x12   :  { %s2855_s9 = smov 0   ;;  %s2857_s10 = smov 0  }
  0x13   :  { %s2859_s11 = smov 0   ;;  %s2861_s12 = smov 0  }
  0x14   :  { %s2863_s13 = smov 0   ;;  %s2865_s14 = smov 0  }
  0x15   :  { %s2867_s15 = smov 0  }
  0x16 LB: > { %3412 = sst [smem:[#allocation23_spill]] %s2734_s28  ;;  %s2903_s16 = sadd.s32 4294967295, %s2770_s15   ;;  %s2770_s15 = sphi %s2867_s15, %s29_s15   ;;  %s2766_s14 = sphi %s2865_s14, %s3468_s14   ;;  %s2762_s13 = sphi %s2863_s13, %s3467_s13   ;;  %s2758_s12 = sphi %s2861_s12, %s3466_s12   ;;  %s2754_s11 = sphi %s2859_s11, %s3465_s11   ;;  %s2750_s10 = sphi %s2857_s10, %s3464_s10   ;;  %s2746_s9 = sphi %s2855_s9, %s3463_s9   ;;  %s2742_s30 = sphi %s2853_s30, %s3462_s30   ;;  %s2738_s29 = sphi %s2851_s29, %s3461_s29   ;;  %s2734_s28 = sphi %s2849_s28, %s3460_s28   ;;  %s2730_s27 = sphi %s2847_s27, %s3457_s27  }
  0x17   : > { %3413 = sst [smem:[#allocation24_spill]] %s2754_s11  ;;  %p1962_p0 = scmp.ge.s32.totalorder %s2770_s15, 1 }
  0x18   : > { %3414 = sst [smem:[#allocation25_spill]] %s2758_s12  ;;  %p3392_p1 = scmp.eq.s32.totalorder %s2903_s16, 0 }
  0x19   : > { %p259_p2 = scmp.lt.s32.totalorder %s2770_s15, 5  ;;  %s2772_s18 = smov [#allocation11]  }
  0x1a   : > { %s271_s19 = sshll.u32 %s2772_s18, 4  ;;  %s2773_s21 = smov [#allocation14]   ;;  %s272_s19 = int_to_ptr.vmem [resolvable:$true] %s271_s19 }
  0x1b   : > { %p2908_p3 = pnand %p1962_p0, %p259_p2  ;;  %s297_s22 = sshll.u32 %s2773_s21, 4  ;;  %s298_s22 = int_to_ptr.vmem [resolvable:$true] %s297_s22 }
  0x1c   : > { %s2461_s23 = scalar_lea.vmem %s272_s19, 256  ;;  %p2469_p10 = scmp.lt.s32.totalorder %s272_s19, %s272_s19 }
  0x1d   : > { %s3415_s17 = scalar_select %p2908_p3, 1, 0 }
  0x1e   : > { %p2243_p4 = pneg %p2908_p3  ;;  %p2462_p7 = scmp.ne.s32.totalorder %s272_s19, %s2461_s23 }
  0x1f   : > { %3416 = sst [smem:[#allocation26_spill]] %s3415_s17  ;;  %p2470_p11 = scmp.lt.s32.totalorder %s2461_s23, %s2461_s23 }
  0x20   : > { %p2916_p5 = pnand %p2243_p4, %p3392_p1 }
  0x21   : > { %p2471_p12 = por %p2470_p11, %p2469_p10 }
  0x22   : > { %p2452_p6 = pneg %p2916_p5 }
  0x24   : > { %p2464_p8 = pnand %p2462_p7, %p2452_p6 }
  0x26   : > { %p2465_p9 = pneg %p2464_p8 }
  0x28   : > { %p2472_p13 = pnand %p2471_p12, %p2465_p9 }
  0x2a   : > { %2475 = shalt.err (!%p2472_p13)
}
  0x2b   : > { %s3386_s24 = smov 64   ;;  %s3388_s25 = smov 4  }
  0x2c   : > { %s3418_s3 = sld [smem:[#allocation32_spill]]  ;;  %s2487_s21 = scalar_lea.vmem %s298_s22, 256 }
  0x2d   : > { %p2488_p0 = scmp.ne.s32.totalorder %s298_s22, %s2487_s21  ;;  %p2495_p7 = scmp.lt.s32.totalorder %s298_s22, %s298_s22 }
  0x2e   : > { %p2496_p8 = scmp.lt.s32.totalorder %s2487_s21, %s2487_s21 }
  0x2f   : > { %p2490_p2 = pnand %p2488_p0, %p2452_p6 }
  0x30   : > { %p2497_p9 = por %p2496_p8, %p2495_p7 }
  0x31   : > { %p2491_p4 = pneg %p2490_p2 }
  0x32   : > { %2246 = dma.hbm_to_vmem [thread:$0]  (!%p2916_p5), %s3418_s3, 256, %s272_s19, [#allocation12], %s3386_s24, %s3386_s24, %s3388_s25  }
  0x33   : > { %p2498_p10 = pnand %p2497_p9, %p2491_p4 }
  0x35   : > { %2501 = shalt.err (!%p2498_p10)
}
  0x36   : > { %s3419_s5 = sld [smem:[#allocation34_spill]]  ;;  %p58_p11 = scmp.eq.s32.totalorder %s2770_s15, 0 }
  0x37   : > { %p83_p12 = scmp.ne.s32.totalorder %s2738_s29, %s2734_s28  ;;  %p89_p13 = scmp.ne.s32.totalorder %s2734_s28, %s2730_s27 }
  0x38   : > { %p3391_p0 = scmp.lt.s32.totalorder %s2770_s15, 4  ;;  %s347_s8 = sand.u32 1, %s2770_s15  }
  0x39   : > { %p85_p2 = por %p83_p12, %p58_p11  ;;  %p2955_p4 = por %p89_p13, %p3392_p1 }
  0x3a   : > { %s349_s26 = sand.u32 1, %s2738_s29   ;;  %s3390_s18 = sshll.u32 %s2766_s14, 8 }
  0x3b   : > { %s3420_s19 = scalar_select %p2955_p4, 1, 0 }
  0x3c   : > { %2252 = dma.hbm_to_vmem [thread:$0]  (!%p2916_p5), %s3419_s5, 256, %s298_s22, [#allocation15], %s3386_s24, %s3386_s24, %s3388_s25  }
  0x3d   : > { %3421 = sst [smem:[#allocation27_spill]] %s3420_s19  ;;  %s1971_s21 = sshll.u32 %s349_s26, 4 }
  0x3e   : > { %s3422_s1 = sld [smem:[#allocation30_spill]]  ;;  %p2968_p7 = pnand %p3391_p0, %p85_p2 }
  0x3f   : > { %s351_s24 = scalar_lea.vmem [#allocation8], %s1971_s21  ;;  %s2972_s5 = scalar_lea.sflag [#allocation9], %s347_s8 }
  0x40   : > { %s358_s25 = sshll.u32 %s351_s24, 4  ;;  %p3397_p8 = pneg %p2968_p7  ;;  %s359_s25 = int_to_ptr.vmem [resolvable:$true] %s358_s25 }
  0x41   : > { %s2515_s26 = scalar_lea.vmem %s359_s25, 256  ;;  %s2776_s3 = smov [#allocation8]  }
  0x42   : > { %p2516_p9 = scmp.ne.s32.totalorder %s359_s25, %s2515_s26  ;;  %s2520_s23 = sshll.u32 %s2776_s3, 4  ;;  %s2521_s23 = int_to_ptr.vmem [resolvable:$false] %s2520_s23 }
  0x43   : > { %p2523_p13 = scmp.lt.s32.totalorder %s359_s25, %s2521_s23 }
  0x44   : > { %s357_s22 = scalar_lea.hbm %s3422_s1, %s3390_s18  ;;  %p2518_p10 = pnand %p2516_p9, %p3397_p8 }
  0x45   : > { %s2522_s18 = scalar_lea.vmem %s2521_s23, 512 }
  0x46   : > { %p2519_p12 = pneg %p2518_p10  ;;  %p2524_p2 = scmp.lt.s32.totalorder %s2522_s18, %s2515_s26 }
  0x48   : > { %p2525_p0 = por %p2524_p2, %p2523_p13 }
  0x4a   : > { %p2526_p1 = pnand %p2525_p0, %p2519_p12 }
  0x4c   : > { %2529 = shalt.err (!%p2526_p1)
}
  0x4d   : > { %s3398_s24 = smov 128   ;;  %s3399_s8 = smov 8  }
  0x4e   : > { %2262 = dma.hbm_to_vmem [thread:$0]  (!%p2968_p7), %s357_s22, 256, %s359_s25, %s2972_s5, %s3398_s24, %s3398_s24, %s3399_s8  }
  0x4f   : > { %s3424_s1 = sshll.u32 %s2766_s14, 8  ;;  %s3425_s2 = sld [smem:[#allocation31_spill]] }
  0x50   : > { %s372_s18 = scalar_lea.vmem [#allocation10], %s1971_s21  ;;  %s2779_s12 = smov [#allocation13]  }
  0x51   : > { %s379_s26 = sshll.u32 %s372_s18, 4  ;;  %s284_s11 = sshll.u32 %s2779_s12, 4  ;;  %s2992_s26 = int_to_ptr.vmem [resolvable:$true] %s379_s26  ;;  %s285_s11 = int_to_ptr.vmem [resolvable:$true] %s284_s11 }
  0x52   : > { %s2780_s19 = smov [#allocation16]   ;;  %s2541_s17 = scalar_lea.vmem %s285_s11, 256 }
  0x53   : > { %s310_s28 = sshll.u32 %s2780_s19, 4  ;;  %p2542_p1 = scmp.ne.s32.totalorder %s285_s11, %s2541_s17  ;;  %s311_s28 = int_to_ptr.vmem [resolvable:$true] %s310_s28 }
  0x54   : > { %p2549_p10 = scmp.lt.s32.totalorder %s285_s11, %s285_s11  ;;  %p2550_p12 = scmp.lt.s32.totalorder %s2541_s17, %s2541_s17 }
  0x55   : > { %s2990_s23 = scalar_lea.hbm %s3425_s2, %s3424_s1  ;;  %p2544_p0 = pnand %p2542_p1, %p2452_p6 }
  0x56   : > { %p2551_p13 = por %p2550_p12, %p2549_p10 }
  0x57   : > { %p2545_p9 = pneg %p2544_p0 }
  0x59   : > { %p2552_p2 = pnand %p2551_p13, %p2545_p9 }
  0x5b   : > { %2555 = shalt.err (!%p2552_p2)
}
  0x5c   : > { %s3426_s1 = smov 4   ;;  %s3427_s7 = smov 64  }
  0x5d   : > { %s3428_s4 = sld [smem:[#allocation33_spill]]  ;;  %s2567_s19 = scalar_lea.vmem %s311_s28, 256 }
  0x5e   : > { %p2568_p8 = scmp.ne.s32.totalorder %s311_s28, %s2567_s19  ;;  %p2575_p10 = scmp.lt.s32.totalorder %s311_s28, %s311_s28 }
  0x5f   : > { %p2576_p9 = scmp.lt.s32.totalorder %s2567_s19, %s2567_s19 }
  0x60   : > { %p2570_p1 = pnand %p2568_p8, %p2452_p6 }
  0x61   : > { %p2577_p12 = por %p2576_p9, %p2575_p10 }
  0x62   : > { %p2571_p0 = pneg %p2570_p1 }
  0x63   : > { %2249 = dma.hbm_to_vmem [thread:$0]  (!%p2916_p5), %s3428_s4, 256, %s285_s11, [#allocation12], %s3427_s7, %s3427_s7, %s3426_s1  }
  0x64   : > { %p2578_p13 = pnand %p2577_p12, %p2571_p0 }
  0x66   : > { %2581 = shalt.err (!%p2578_p13)
}
  0x67   : > { %s3429_s6 = sld [smem:[#allocation35_spill]]  ;;  %s1961_s11 = sadd.s32 4294967294, %s2770_s15  }
  0x68   : > { %s38_s20 = sadd.s32 1, %s2762_s13  ;;  %s41_s22 = sadd.s32 1, %s2766_s14 }
  0x69   : > { %p39_p6 = scmp.ge.s32.totalorder %s38_s20, 2  ;;  %s50_s3 = sadd.s32 1, %s2750_s10 }
  0x6a   : > { %p57_p8 = scmp.ne.s32.totalorder %s2750_s10, %s2746_s9  ;;  %p63_p2 = scmp.ne.s32.totalorder %s2746_s9, %s2742_s30 }
  0x6b   : > { %s3470_s20 = smov (%p39_p6, %s38_s20), 0  ;;  %s3472_s22 = smov (!%p39_p6, %s41_s22), %s2766_s14 }
  0x6c   : > { %3430 = sst [smem:[#allocation28_spill]] %s3470_s20  ;;  %s46_s18 = ssub.s32 %s2762_s13, %s3470_s20 }
  0x6d   : > { %2255 = dma.hbm_to_vmem [thread:$0]  (!%p2916_p5), %s3429_s6, 256, %s311_s28, [#allocation15], %s3427_s7, %s3427_s7, %s3426_s1  }
  0x6e   : > { %p3031_p5 = por %p58_p11, %p57_p8  ;;  %p43_p1 = scmp.ge.s32.totalorder %s3472_s22, 2 }
  0x6f   : > { %p3432_p0 = scmp.eq.s32.totalorder %s2903_s16, 0  ;;  %s76_s7 = sadd.s32 1, %s2738_s29 }
  0x70   : > { %p246_p9 = scmp.eq.s32.totalorder %s2903_s16, 3  ;;  %s3474_s22 = smov (%p43_p1, %s3472_s22), 0 }
  0x71   : > { %p3040_p10 = por %p3432_p0, %p63_p2  ;;  %3434 = sst [smem:[#allocation29_spill]] %s3474_s22 }
  0x72   : > { %p3048_p12 = por %p246_p9, %p57_p8  ;;  %p252_p11 = scmp.eq.s32.totalorder %s1961_s11, 3 }
  0x73   : > { %s45_s25 = ssub.s32 %s2766_s14, %s3474_s22  ;;  %s327_s19 = sand.u32 1, %s2750_s10  }
  0x74   : > { %s3435_s12 = scalar_select %p3048_p12, 1, 0 }
  0x75   : > { %s47_s17 = sor.u32 %s46_s18, %s45_s25  ;;  %p74_p13 = scmp.eq.s32.totalorder %s45_s25, 0 }
  0x76   : > { %p48_p6 = scmp.eq.s32.totalorder %s47_s17, 0  ;;  %p3058_p0 = por %p252_p11, %p63_p2 }
  0x77   : > { %s3063_s24 = scalar_select %p74_p13, %s2738_s29, %s76_s7  }
  0x78   : > { %s3436_s21 = scalar_select %p3058_p0, 1, 0 }
  0x79   : > { %s3066_s8 = scalar_select %p48_p6, %s2750_s10, %s50_s3  }
  0x7a   : > { %s1968_s11 = sshll.u32 %s327_s19, 3  ;;  %s1969_s2 = sshll.u32 %s2766_s14, 1 }
  0x7b   : > { %s336_s4 = sadd.s32 %s2762_s13, %s1969_s2  ;;  %s331_s6 = scalar_lea.vmem [#allocation5], %s1968_s11 }
  0x7c   : > { %s340_s18 = sshll.u32 %s331_s6, 4  ;;  %s1970_s22 = sshll.u32 %s336_s4, 7  ;;  %s3072_s18 = int_to_ptr.vmem [resolvable:$true] %s340_s18 }
  0x7d   : > { %s3077_s20 = scalar_lea.hbm %s3376_s0, %s1970_s22  ;;  %p3437_p8 = scmp.lt.s32.totalorder %s2770_s15, 4 }
  0x7e   : > { %s2595_s7 = scalar_lea.vmem %s2992_s26, 256  ;;  %p3439_p9 = pneg %p2968_p7 }
  0x7f   : > { %p3083_p2 = pnand %p3437_p8, %p3031_p5  ;;  %p2596_p1 = scmp.ne.s32.totalorder %s2992_s26, %s2595_s7 }
  0x80   : > { %s2781_s2 = smov [#allocation10]  }
  0x81   : > { %p2598_p11 = pnand %p2596_p1, %p3439_p9  ;;  %s2600_s4 = sshll.u32 %s2781_s2, 4  ;;  %s2601_s4 = int_to_ptr.vmem [resolvable:$false] %s2600_s4 }
  0x82   : > { %s2602_s6 = scalar_lea.vmem %s2601_s4, 512  ;;  %p2603_p6 = scmp.lt.s32.totalorder %s2992_s26, %s2601_s4 }
  0x83   : > { %p2599_p13 = pneg %p2598_p11  ;;  %p2604_p0 = scmp.lt.s32.totalorder %s2602_s6, %s2595_s7 }
  0x85   : > { %p2605_p12 = por %p2604_p0, %p2603_p6 }
  0x87   : > { %p2606_p4 = pnand %p2605_p12, %p2599_p13 }
  0x89   : > { %2609 = shalt.err (!%p2606_p4)
}
  0x8a   : > { %s3440_s22 = smov 8   ;;  %s3441_s28 = smov 128  }
  0x8b   : > { %2265 = dma.hbm_to_vmem [thread:$0]  (!%p2968_p7), %s2990_s23, 256, %s2992_s26, %s2972_s5, %s3441_s28, %s3441_s28, %s3440_s22  }
  0x8c   : > { %s328_s11 = scalar_lea.sflag [#allocation6], %s327_s19  ;;  %p2612_p5 = pneg %p3083_p2 }
  0x8d   : > { %s2623_s25 = scalar_lea.vmem %s3072_s18, 128  ;;  %s2782_s27 = smov [#allocation5]  }
  0x8e   : > { %p2624_p4 = scmp.ne.s32.totalorder %s3072_s18, %s2623_s25  ;;  %s2628_s17 = sshll.u32 %s2782_s27, 4  ;;  %s2629_s17 = int_to_ptr.vmem [resolvable:$false] %s2628_s17 }
  0x8f   : > { %s2630_s7 = scalar_lea.vmem %s2629_s17, 256  ;;  %p2631_p8 = scmp.lt.s32.totalorder %s3072_s18, %s2629_s17 }
  0x90   : > { %p2626_p12 = pnand %p2624_p4, %p2612_p5  ;;  %p2632_p1 = scmp.lt.s32.totalorder %s2630_s7, %s2623_s25 }
  0x92   : > { %p2627_p0 = pneg %p2626_p12  ;;  %p2633_p9 = por %p2632_p1, %p2631_p8 }
  0x94   : > { %p2634_p11 = pnand %p2633_p9, %p2627_p0 }
  0x96   : > { %2637 = shalt.err (!%p2634_p11)
}
  0x97   : > { %2259 = dma.hbm_to_vmem [thread:$0]  (!%p3083_p2), %s3077_s20, 128, %s3072_s18, %s328_s11  }
  0x98   : > { %391 = sbr.rel (%p2908_p3) target bundleno = 1837 (0x72d), region = 52  ;;  %s3115_s23 = sand.u32 (!%p2908_p3), 1, %s2746_s9  }
  0x99   : > { %s1978_s26 = sshll.u32 (!%p2908_p3), %s3115_s23, 3  ;;  %s394_s19 = scalar_lea.sflag (!%p2908_p3), [#allocation6], %s3115_s23 }
  0x9a   : > { %s3119_s2 = scalar_lea.vmem (!%p2908_p3), [#allocation5], %s1978_s26 }
  0x9d   : > { %2709 = dma.done.wait (%p3040_p10), %s394_s19, 128  }
  0x9e   : > { %2711 = vsyncadd (%p3040_p10), %s394_s19, 4294967168  ;;  %s3443_s20 = sld [smem:[#allocation23_spill]]  ;;  %s402_s3 = sand.u32 1, %s2903_s16  }
  0x9f   : > { %s3444_s18 = sld [smem:[#allocation27_spill]]  ;;  %s403_s22 = scalar_lea.sflag [#allocation9], %s402_s3 }
  0xa4   : > { %s404_s4 = sand.u32 1, %s3443_s20  }
  0xa5   : > { %s3127_s6 = sshll.u32 %s404_s4, 4  ;;  %p3445_p3 = scmp.ne.s32.totalorder %s3444_s18, 0 }
  0xa6   : > { %s406_s28 = scalar_lea.vmem [#allocation8], %s3127_s6 }
  0xa7   : > { %2713 = dma.done.wait (%p3445_p3), %s403_s22, 512  }
  0xa8   : > { %2715 = vsyncadd (%p3445_p3), %s403_s22, 4294966784  ;;  %s415_s11 = scalar_lea.vmem [#allocation10], %s3127_s6  ;;  %p3446_p7 = scmp.eq.s32.totalorder %s2903_s16, 0 }
  0xaa   : > { %2717 = dma.done.wait (%p3446_p7), [#allocation12], 512   ;;  %p3447_p10 = pmov %p3446_p7 }
  0xab   : > { %p3448_p2 = pmov %p3446_p7 }
  0xac   : > { %2719 = vsyncadd (%p3447_p10), [#allocation12], 4294966784 }
  0xad   : > { %2721 = dma.done.wait (%p3448_p2), [#allocation15], 512   ;;  %p3449_p13 = pmov %p3448_p2 }
  0xae   : > { %s3143_s1 = scalar_lea.vmem [#allocation17], %s1978_s26  ;;  %s3450_s25 = sld [smem:[#allocation24_spill]] }
  0xaf   : > { %2723 = vsyncadd (%p3449_p13), [#allocation15], 4294966784 }
  0xb4   : > { %p1986_p6 = scmp.ne.s32.totalorder %s3450_s25, 0 }
  0xb6   : > { %478 = sbr.rel (%p1986_p6) target bundleno = 397 (0x18d), region = 84 }
  0xbb   : > { %v2394_v0 = vld [vmem:[#allocation13 + $0x8] sm:$0xff]   ;;  %v2783_v1 = vmov 0.0   ;;  %v2395_v2 = vld [vmem:[#allocation14 + $0x8] sm:$0xff]   ;;  %v2396_v3 = vld [vmem:[#allocation13] sm:$0xff]   ;;  %vm2784_vm0 = vmmov 0   ;;  %vm498_vm1 = vcmask 261120  }
  0xbc   : > { %2091 = vmatprep.subr.bf16.mxu0 %v2783_v1  ;;  %2099 = vmatprep.subr.bf16.mxu1 %v2783_v1  ;;  %v2397_v4 = vld [vmem:[#allocation14] sm:$0xff]   ;;  %v480_v6 = vld [vmem:[%s406_s28 + $0x8] sm:$0xff]  ;;  %vm551_vm2 = vcmask 257024  }
  0xbd   : > { %2092 = vmatpush3.bf16.msra.mxu0 %v2394_v0  ;;  %2095 = vmatprep.mubr.msk.bf16.mxu0 %vm2784_vm0, %v2783_v1  ;;  %v479_v5 = vld [vmem:[%s406_s28] sm:$0xff]  ;;  %v555_v9 = vld [vmem:[%s415_s11 + $0x8] sm:$0xff] }
  0xbe   : > { %2100 = vmatpush3.bf16.msra.mxu1 %v2395_v2  ;;  %2093 = vmatprep.subr.bf16.mxu0 %v2783_v1  ;;  %v554_v7 = vld [vmem:[%s415_s11] sm:$0xff]  ;;  %v481_v8 = vpack.c.bf16 %v480_v6, %v479_v5  ;;  %v557_v11 = vadd.f32 %v555_v9, %v480_v6 }
  0xbf   : > { %2101 = vmatprep.subr.bf16.mxu1 %v2783_v1  ;;  %2103 = vmatprep.mubr.msk.bf16.mxu1 %vm2784_vm0, %v2783_v1  ;;  %v556_v10 = vadd.f32 %v554_v7, %v479_v5 }
  0xc1   : > { %2094 = vmatpush3.bf16.msra.mxu0 %v2396_v3  ;;  %v558_v12 = vpack.c.bf16 %v557_v11, %v556_v10 }
  0xc2   : > { %2102 = vmatpush3.bf16.msra.mxu1 %v2397_v4 }
  0xc4   : > { %2096 = vmatmul.mubr.msk.bf16.vlgmr.msra.gmra.mxu0 %vm498_vm1, %v481_v8 }
  0xc5   : > { %2104 = vmatmul.mubr.msk.bf16.vlgmr.msra.gmra.mxu1 %vm498_vm1, %v558_v12 }
 0x184   : > { %v536_v13 = vpop.f32.mrf.mxu0 }
 0x185   : > { %v2043_v14 = vpack.c.bf16 %v536_v13, %v536_v13  ;;  %v612_v15 = vpop.f32.mrf.mxu1 }
 0x186   : > { %v2045_v16 = vpack.c.bf16 %v612_v15, %v612_v15  ;;  %v2097_v17 = vpop.f32.mrf.mxu0 }
 0x187   : > { %552 = vst.msk [vmem:[#allocation2] sm:$0xf] %vm551_vm2, %v2043_v14  ;;  %v2105_v18 = vpop.f32.mrf.mxu1 }
 0x188   : > { %627 = vst.msk [vmem:[#allocation3] sm:$0xf] %vm551_vm2, %v2045_v16  ;;  %v539_v19 = vpop.f32.mrf.mxu0 }
 0x189   : > { %v2044_v20 = vpack.c.bf16 %v539_v19, %v539_v19  ;;  %v615_v21 = vpop.f32.mrf.mxu1 }
 0x18a   : > { %v2046_v22 = vpack.c.bf16 %v615_v21, %v615_v21  ;;  %v2098_v23 = vpop.f32.mrf.mxu0 }
 0x18b   : > { %553 = vst.msk [vmem:[#allocation2 + $0x4] sm:$0xf] %vm551_vm2, %v2044_v20  ;;  %v2106_v24 = vpop.f32.mrf.mxu1 }
 0x18c   : > { %628 = vst.msk [vmem:[#allocation3 + $0x4] sm:$0xf] %vm551_vm2, %v2046_v22 }
 0x18d PF: > { %v2398_v25 = vld [vmem:[#allocation11 + $0x8] sm:$0xff]   ;;  %v2785_v26 = vmov 0.0   ;;  %v2399_v27 = vld [vmem:[#allocation11] sm:$0xff]   ;;  %vm2786_vm3 = vmmov 0   ;;  %v629_v28 = vld [vmem:[%s3119_s2] sm:$0xff]  ;;  %vm702_vm4 = vcmask 31744  }
 0x18e   : > { %2107 = vmatprep.subr.bf16.mxu0 %v2785_v26  ;;  %2115 = vmatprep.subr.bf16.mxu1 %v2785_v26  ;;  %v630_v31 = vpack.c.bf16 %v629_v28, %v629_v28  ;;  %s2787_s16 = smov 124   ;;  %vm647_vm5 = vcmask 261120   ;;  %s2788_s27 = smov 120   ;;  %vm749_vm6 = vcmask 130048   ;;  %vm939_vm7 = vcmask 64544  }
 0x18f   : > { %2108 = vmatpush3.bf16.msra.mxu0 %v2398_v25  ;;  %2111 = vmatprep.mubr.msk.bf16.mxu0 %vm2786_vm3, %v2785_v26  ;;  %s2789_s17 = smov 116   ;;  %s2790_s7 = smov 112   ;;  %vm1067_vm8 = vcmask 97344   ;;  %vm1195_vm9 = vcmask 130144   ;;  %vm1323_vm10 = vcmask 162944   ;;  %vm1451_vm11 = vcmask 195744  }
 0x190   : > { %2109 = vmatprep.subr.bf16.mxu0 %v2785_v26  ;;  %2117 = vmatprep.mubr.msk.bf16.mxu1 %vm2786_vm3, %v2785_v26  ;;  %s2791_s5 = smov 108   ;;  %s2792_s26 = smov 104   ;;  %vm1579_vm12 = vcmask 228544   ;;  %vm1707_vm13 = vcmask 261344  }
 0x191   : > { %s2793_s19 = smov 100   ;;  %s2794_s2 = smov 4  }
 0x192   : > { %v2400_v29 = vld [vmem:[#allocation2] sm:$0xff]   ;;  %s2795_s20 = smov 8   ;;  %s2796_s18 = smov 12  }
 0x193   : > { %v2401_v30 = vld [vmem:[#allocation2] sm:$0xff]   ;;  %824 = vrot.lane.b32.xlu0 %v2400_v29, %s2787_s16  ;;  %2110 = vmatpush3.bf16.msra.mxu0 %v2399_v27  ;;  %s2797_s3 = smov 16   ;;  %s2798_s4 = smov 20  }
 0x194   : > { %v707_v32 = vsel %vm702_vm4, %v2401_v30, 0  ;;  %2121 = vmatprep.subr.bf16.mxu0 %v2785_v26  ;;  %v2402_v33 = vld [vmem:[#allocation2] sm:$0xff]   ;;  %s2799_s6 = smov 24   ;;  %s2800_s22 = smov 28  }
 0x195   : > { %2116 = vmatpush3.bf16.xpose.msra.mxu1 %v707_v32  ;;  %952 = vrot.lane.b32.xlu1 %v2402_v33, %s2788_s27  ;;  %v2403_v41 = vld [vmem:[#allocation2] sm:$0xff]   ;;  %s3451_s28 = sld [smem:[#allocation25_spill]]  ;;  %p3455_p4 = scmp.ne.s32.totalorder %s3435_s12, 0 }
 0x196   : > { %2127 = vmatprep.subr.bf16.mxu1 %v2785_v26  ;;  %2112 = vmatmul.mubr.msk.bf16.vlgmr.msra.gmra.mxu0 %vm647_vm5, %v630_v31  ;;  %v2404_v43 = vld [vmem:[#allocation2] sm:$0xff]   ;;  %s3452_s11 = sld [smem:[#allocation24_spill]] }
 0x197   : > { %2123 = vmatprep.mubr.msk.bf16.mxu0 %vm2786_vm3, %v2785_v26  ;;  %v2405_v44 = vld [vmem:[#allocation2] sm:$0xff]  }
 0x198   : > { %v2406_v45 = vld [vmem:[#allocation2] sm:$0xff]  }
 0x199   : > { %v2407_v46 = vld [vmem:[#allocation2] sm:$0xff]  }
 0x19b   : > { %s2037_s25 = sshll.u32 %s3451_s28, 1 }
 0x205   : > { %v825_v36 = vpop.permute.xlu0 %824 }
 0x206   : > { %v830_v40 = vsel %vm702_vm4, %v825_v36, 0 }
 0x207   : > { %v953_v47 = vpop.permute.xlu1 %952 }
 0x208   : > { %v958_v48 = vsel %vm702_vm4, %v953_v47, 0 }
 0x256   : > { %v685_v34 = vpop.f32.mrf.mxu0 }
 0x257   : > { %v691_v35 = vmul.f32 0.5, %v685_v34 }
 0x258   : > { %v2113_v37 = vpop.f32.mrf.mxu0 }
 0x259   : > { %v692_v38 = vpack.c.bf16 %v691_v35, %v691_v35 }
 0x25a   : > { %v688_v39 = vpop.f32.mrf.mxu0 }
 0x25b   : > { %945 = vrot.lane.b32.xlu1 %v692_v38, %s2788_s27  ;;  %817 = vrot.lane.b32.xlu0 %v692_v38, %s2787_s16 }
 0x25c   : > { %2118 = vmatmul.mubr.msk.bf16.vlgmr.msra.gmra.mxu1 %vm702_vm4, %v692_v38  ;;  %v2114_v42 = vpop.f32.mrf.mxu0 }
 0x25d   : > { %2128 = vmatpush3.bf16.xpose.msra.mxu1 %v830_v40  ;;  %2129 = vmatprep.mubr.msk.bf16.mxu1 %vm2786_vm3, %v2785_v26 }
 0x25e   : > { %2139 = vmatprep.subr.bf16.mxu1 %v2785_v26 }
 0x25f   : > { %1073 = vrot.lane.b32.xlu1 %v692_v38, %s2789_s17  ;;  %1080 = vrot.lane.b32.xlu0 %v2403_v41, %s2789_s17 }
 0x263   : > { %1201 = vrot.lane.b32.xlu1 %v692_v38, %s2790_s7  ;;  %1208 = vrot.lane.b32.xlu0 %v2404_v43, %s2790_s7 }
 0x267   : > { %1329 = vrot.lane.b32.xlu1 %v692_v38, %s2791_s5  ;;  %1336 = vrot.lane.b32.xlu0 %v2405_v44, %s2791_s5 }
 0x26b   : > { %1457 = vrot.lane.b32.xlu1 %v692_v38, %s2792_s26  ;;  %1464 = vrot.lane.b32.xlu0 %v2406_v45, %s2792_s26 }
 0x26f   : > { %1585 = vrot.lane.b32.xlu1 %v692_v38, %s2793_s19  ;;  %1592 = vrot.lane.b32.xlu0 %v2407_v46, %s2793_s19 }
 0x2cd   : > { %v818_v49 = vpop.permute.xlu0 %817  ;;  %v946_v52 = vpop.permute.xlu1 %945 }
 0x2ce   : > { %2130 = vmatmul.mubr.msk.bf16.vlgmr.msra.gmra.mxu1 %vm702_vm4, %v818_v49  ;;  %v2408_v49 = vld [vmem:[#allocation3] sm:$0xff]  }
 0x2cf   : > { %2140 = vmatpush3.bf16.xpose.msra.mxu1 %v958_v48  ;;  %2141 = vmatprep.mubr.msk.bf16.mxu1 %vm2786_vm3, %v2785_v26  ;;  %v2409_v48 = vld [vmem:[#allocation3] sm:$0xff]  }
 0x2d0   : > { %2151 = vmatprep.subr.bf16.mxu1 %v2785_v26 }
 0x2d1   : > { %v1081_v50 = vpop.permute.xlu0 %1080  ;;  %v1074_v55 = vpop.permute.xlu1 %1073 }
 0x2d2   : > { %v1086_v51 = vsel %vm702_vm4, %v1081_v50, 0  ;;  %v2412_v50 = vld [vmem:[#allocation3] sm:$0xff]  }
 0x2d3   : > { %2122 = vmatpush3.bf16.msra.mxu0 %v2412_v50 }
 0x2d4   : > { %2133 = vmatprep.subr.bf16.mxu0 %v2785_v26 }
 0x2d5   : > { %v1209_v53 = vpop.permute.xlu0 %1208  ;;  %v1202_v58 = vpop.permute.xlu1 %1201 }
 0x2d6   : > { %2142 = vmatmul.mubr.msk.bf16.vlgmr.msra.gmra.mxu1 %vm702_vm4, %v946_v52  ;;  %v1214_v54 = vsel %vm702_vm4, %v1209_v53, 0 }
 0x2d7   : > { %2152 = vmatpush3.bf16.xpose.msra.mxu1 %v1086_v51  ;;  %2153 = vmatprep.mubr.msk.bf16.mxu1 %vm2786_vm3, %v2785_v26 }
 0x2d8   : > { %2163 = vmatprep.subr.bf16.mxu1 %v2785_v26 }
 0x2d9   : > { %v1337_v56 = vpop.permute.xlu0 %1336  ;;  %v1330_v61 = vpop.permute.xlu1 %1329 }
 0x2da   : > { %v1342_v57 = vsel %vm702_vm4, %v1337_v56, 0 }
 0x2dd   : > { %v1465_v59 = vpop.permute.xlu0 %1464  ;;  %v1458_v0 = vpop.permute.xlu1 %1457 }
 0x2de   : > { %2154 = vmatmul.mubr.msk.bf16.vlgmr.msra.gmra.mxu1 %vm702_vm4, %v1074_v55  ;;  %v1470_v60 = vsel %vm702_vm4, %v1465_v59, 0 }
 0x2df   : > { %2164 = vmatpush3.bf16.xpose.msra.mxu1 %v1214_v54  ;;  %2165 = vmatprep.mubr.msk.bf16.mxu1 %vm2786_vm3, %v2785_v26 }
 0x2e0   : > { %2175 = vmatprep.subr.bf16.mxu1 %v2785_v26 }
 0x2e1   : > { %v1593_v62 = vpop.permute.xlu0 %1592  ;;  %v1586_v1 = vpop.permute.xlu1 %1585 }
 0x2e2   : > { %v1598_v63 = vsel %vm702_vm4, %v1593_v62, 0 }
 0x2e6   : > { %2166 = vmatmul.mubr.msk.bf16.vlgmr.msra.gmra.mxu1 %vm702_vm4, %v1202_v58 }
 0x2e7   : > { %2176 = vmatpush3.bf16.xpose.msra.mxu1 %v1342_v57  ;;  %2177 = vmatprep.mubr.msk.bf16.mxu1 %vm2786_vm3, %v2785_v26 }
 0x2e8   : > { %2187 = vmatprep.subr.bf16.mxu1 %v2785_v26 }
 0x2ee   : > { %2178 = vmatmul.mubr.msk.bf16.vlgmr.msra.gmra.mxu1 %vm702_vm4, %v1330_v61 }
 0x2ef   : > { %2188 = vmatpush3.bf16.xpose.msra.mxu1 %v1470_v60  ;;  %2189 = vmatprep.mubr.msk.bf16.mxu1 %vm2786_vm3, %v2785_v26 }
 0x2f0   : > { %2199 = vmatprep.subr.bf16.mxu1 %v2785_v26 }
 0x2f6   : > { %2190 = vmatmul.mubr.msk.bf16.vlgmr.msra.gmra.mxu1 %vm702_vm4, %v1458_v0 }
 0x2f7   : > { %2200 = vmatpush3.bf16.xpose.msra.mxu1 %v1598_v63  ;;  %2201 = vmatprep.mubr.msk.bf16.mxu1 %vm2786_vm3, %v2785_v26 }
 0x2f8   : > { %2211 = vmatprep.subr.bf16.mxu1 %v2785_v26 }
 0x2fe   : > { %2202 = vmatmul.mubr.msk.bf16.vlgmr.msra.gmra.mxu1 %vm702_vm4, %v1586_v1 }
 0x2ff   : > { %2215 = vmatprep.mubr.msk.bf16.mxu1 %vm2786_vm3, %v2785_v26 }
 0x31c   : > { %v743_v2 = vpop.f32.mrf.mxu1 }
 0x31d   : > { %v750_v3 = vsel %vm749_vm6, %v743_v2, -inf }
 0x31e   : > { %751 = vmax.xlane.f32.xlu0 %v750_v3  ;;  %v2119_v4 = vpop.f32.mrf.mxu1 }
 0x31f   : > { %v2410_v4 = vld [vmem:[#allocation3] sm:$0xff]  }
 0x320   : > { %v746_v5 = vpop.f32.mrf.mxu1 }
 0x322   : > { %v2120_v6 = vpop.f32.mrf.mxu1 }
 0x38e   : > { %v866_v7 = vpop.f32.mrf.mxu1 }
 0x38f   : > { %v872_v8 = vsel %vm749_vm6, %v866_v7, -inf }
 0x390   : > { %873 = vmax.xlane.f32.xlu1 %v872_v8  ;;  %v2131_v9 = vpop.f32.mrf.mxu1 }
 0x392   : > { %v869_v10 = vpop.f32.mrf.mxu1 }
 0x394   : > { %v2132_v11 = vpop.f32.mrf.mxu1 }
 0x396   : > { %v994_v12 = vpop.f32.mrf.mxu1 }
 0x397   : > { %v1000_v13 = vsel %vm749_vm6, %v994_v12, -inf }
 0x398   : > { %1001 = vmax.xlane.f32.xlu0 %v1000_v13  ;;  %v2143_v14 = vpop.f32.mrf.mxu1 }
 0x39a   : > { %v997_v15 = vpop.f32.mrf.mxu1 }
 0x39c   : > { %v2144_v16 = vpop.f32.mrf.mxu1 }
 0x39e   : > { %v1122_v17 = vpop.f32.mrf.mxu1 }
 0x39f   : > { %v1128_v18 = vsel %vm749_vm6, %v1122_v17, -inf }
 0x3a0   : > { %1129 = vmax.xlane.f32.xlu0 %v1128_v18  ;;  %v2155_v19 = vpop.f32.mrf.mxu1 }
 0x3a2   : > { %v1125_v20 = vpop.f32.mrf.mxu1 }
 0x3a4   : > { %v2156_v21 = vpop.f32.mrf.mxu1 }
 0x3a6   : > { %v3216_v22 = vpop.f32.mrf.mxu1 }
 0x3a7   : > { %v752_v23 = vpop.xlane.xlu0 %751  ;;  %v1256_v24 = vsel %vm749_vm6, %v3216_v22, -inf }
 0x3a8   : > { %v753_v25 = vsub.f32 %v743_v2, %v752_v23  ;;  %1257 = vmax.xlane.f32.xlu1 %v1256_v24  ;;  %v2167_v27 = vpop.f32.mrf.mxu1 }
 0x3aa   : > { %v754_v28 = vmul.f32 1.442695, %v753_v25  ;;  %v1253_v29 = vpop.f32.mrf.mxu1 }
 0x3ac   : > { %2418 = vpow2.f32 %v754_v28  ;;  %v2168_v30 = vpop.f32.mrf.mxu1 }
 0x3ad   : > { %v2413_v30 = vld [vmem:[#allocation3] sm:$0xff]  }
 0x3ae   : > { %v3220_v31 = vpop.f32.mrf.mxu1 }
 0x3af   : > { %v1384_v32 = vsel %vm749_vm6, %v3220_v31, -inf }
 0x3b0   : > { %1385 = vmax.xlane.f32.xlu0 %v1384_v32  ;;  %v2179_v33 = vpop.f32.mrf.mxu1  ;;  %v2415_v32 = vld [vmem:[#allocation3] sm:$0xff]  }
 0x3b2   : > { %v1381_v34 = vpop.f32.mrf.mxu1 }
 0x3b4   : > { %v2180_v35 = vpop.f32.mrf.mxu1 }
 0x3b6   : > { %v3224_v36 = vpop.f32.mrf.mxu1 }
 0x3b7   : > { %v1512_v37 = vsel %vm749_vm6, %v3224_v36, -inf }
 0x3b8   : > { %1513 = vmax.xlane.f32.xlu1 %v1512_v37  ;;  %v2191_v38 = vpop.f32.mrf.mxu1 }
 0x3b9   : > { %v2419_v39 = vpop.eup %2418 }
 0x3ba   : > { %v1509_v40 = vpop.f32.mrf.mxu1  ;;  %v756_v41 = vsel %vm749_vm6, %v2419_v39, 0.0 }
 0x3bc   : > { %757 = vadd.xlane.f32.xlu1 %v756_v41  ;;  %v2192_v42 = vpop.f32.mrf.mxu1 }
 0x3be   : > { %v1634_v43 = vpop.f32.mrf.mxu1 }
 0x3bf   : > { %v1640_v44 = vsel %vm749_vm6, %v1634_v43, -inf }
 0x3c0   : > { %1641 = vmax.xlane.f32.xlu0 %v1640_v44  ;;  %v2203_v45 = vpop.f32.mrf.mxu1 }
 0x3c2   : > { %v1637_v46 = vpop.f32.mrf.mxu1 }
 0x3c4   : > { %v2204_v47 = vpop.f32.mrf.mxu1 }
 0x3cd   : > { %1017 = vrot.lane.b32.xlu1 %v2409_v48, %s2788_s27 }
 0x3d6   : > { %889 = vrot.lane.b32.xlu0 %v2408_v49, %s2787_s16  ;;  %s1790_s16 = sadd.s32 %s3452_s11, %s2037_s25 }
 0x419   : > { %v874_v51 = vpop.xlane.xlu1 %873 }
 0x41a   : > { %v875_v52 = vsub.f32 %v866_v7, %v874_v51  ;;  %v2411_v7 = vld [vmem:[#allocation3] sm:$0xff]  }
 0x41c   : > { %v876_v53 = vmul.f32 1.442695, %v875_v52 }
 0x41e   : > { %2420 = vpow2.f32 %v876_v53 }
 0x421   : > { %v1002_v54 = vpop.xlane.xlu0 %1001 }
 0x422   : > { %v1003_v55 = vsub.f32 %v994_v12, %v1002_v54 }
 0x424   : > { %v1004_v56 = vmul.f32 1.442695, %v1003_v55 }
 0x426   : > { %2422 = vpow2.f32 %v1004_v56 }
 0x429   : > { %v1130_v57 = vpop.xlane.xlu0 %1129 }
 0x42a   : > { %v1131_v58 = vsub.f32 %v1122_v17, %v1130_v57 }
 0x42b   : > { %v3233_v59 = vpop.eup %2420 }
 0x42c   : > { %v1132_v60 = vmul.f32 1.442695, %v1131_v58  ;;  %v878_v61 = vsel %vm749_vm6, %v3233_v59, 0.0 }
 0x42d   : > { %879 = vadd.xlane.f32.xlu0 %v878_v61 }
 0x42e   : > { %2424 = vpow2.f32 %v1132_v60 }
 0x431   : > { %v1258_v2 = vpop.xlane.xlu1 %1257 }
 0x432   : > { %v1259_v8 = vsub.f32 %v3216_v22, %v1258_v2 }
 0x433   : > { %v3237_v62 = vpop.eup %2422 }
 0x434   : > { %v1006_v63 = vsel %vm749_vm6, %v3237_v62, 0.0  ;;  %v1260_v11 = vmul.f32 1.442695, %v1259_v8 }
 0x435   : > { %1007 = vadd.xlane.f32.xlu1 %v1006_v63 }
 0x439   : > { %v1386_v6 = vpop.xlane.xlu0 %1385 }
 0x43a   : > { %v1387_v12 = vsub.f32 %v3220_v31, %v1386_v6  ;;  %v2414_v31 = vld [vmem:[#allocation3] sm:$0xff]  }
 0x43b   : > { %v3241_v0 = vpop.eup %2424 }
 0x43c   : > { %v1134_v1 = vsel %vm749_vm6, %v3241_v0, 0.0  ;;  %v1388_v17 = vmul.f32 1.442695, %v1387_v12 }
 0x43d   : > { %1135 = vadd.xlane.f32.xlu0 %v1134_v1 }
 0x441   : > { %v1514_v3 = vpop.xlane.xlu1 %1513 }
 0x442   : > { %v1515_v16 = vsub.f32 %v3224_v36, %v1514_v3 }
 0x444   : > { %v1516_v19 = vmul.f32 1.442695, %v1515_v16 }
 0x445   : > { %v758_v5 = vpop.xlane.xlu1 %757 }
 0x446   : > { %1145 = vrot.lane.b32.xlu1 %v2410_v4, %s2789_s17  ;;  %2426 = vrcp.f32 %v758_v5 }
 0x447   : > { %2428 = vpow2.f32 %v1260_v11 }
 0x448   : > { %2430 = vpow2.f32 %v1388_v17 }
 0x449   : > { %v1642_v9 = vpop.xlane.xlu0 %1641  ;;  %2432 = vpow2.f32 %v1516_v19  ;;  %v1018_v34 = vpop.permute.xlu1 %1017 }
 0x44a   : > { %v1643_v18 = vsub.f32 %v1634_v43, %v1642_v9 }
 0x44c   : > { %v1644_v20 = vmul.f32 1.442695, %v1643_v18 }
 0x44d   : > { %v890_v15 = vpop.permute.xlu0 %889 }
 0x44e   : > { %2434 = vpow2.f32 %v1644_v20 }
 0x453   : > { %1273 = vrot.lane.b32.xlu0 %v2411_v7, %s2790_s7  ;;  %v2427_v10 = vpop.eup %2426  ;;  %s3453_s7 = sld [smem:[#allocation36_spill]] }
 0x454   : > { %v760_v13 = vmul.f32 %v2427_v10, %v2419_v39  ;;  %v2429_v21 = vpop.eup %2428 }
 0x455   : > { %v1262_v22 = vsel %vm749_vm6, %v2429_v21, 0.0  ;;  %v3255_v23 = vpop.eup %2430 }
 0x456   : > { %v761_v14 = vpack.c.bf16 %v760_v13, %v760_v13  ;;  %v3257_v24 = vpop.eup %2432  ;;  %v1390_v25 = vsel %vm749_vm6, %v3255_v23, 0.0 }
 0x457   : > { %v1518_v28 = vsel %vm749_vm6, %v3257_v24, 0.0 }
 0x458   : > { %2124 = vmatmul.mubr.msk.bf16.vlgmr.msra.gmra.mxu0 %vm749_vm6, %v761_v14 }
 0x459   : > { %2134 = vmatpush3.bf16.msra.mxu0 %v890_v15  ;;  %2135 = vmatprep.mubr.msk.bf16.mxu0 %vm2786_vm3, %v2785_v26 }
 0x45a   : > { %2145 = vmatprep.subr.bf16.mxu0 %v2785_v26 }
 0x45b   : > { %v3261_v27 = vpop.eup %2434 }
 0x45c   : > { %v1646_v29 = vsel %vm749_vm6, %v3261_v27, 0.0 }
 0x46a   : > { %1263 = vadd.xlane.f32.xlu1 %v1262_v22 }
 0x46e   : > { %1391 = vadd.xlane.f32.xlu1 %v1390_v25 }
 0x472   : > { %1519 = vadd.xlane.f32.xlu0 %v1518_v28  ;;  %1647 = vadd.xlane.f32.xlu1 %v1646_v29  ;;  %v2417_v29 = vld [vmem:[#allocation16] sm:$0xff]  }
 0x483   : > { %1401 = vrot.lane.b32.xlu1 %v2413_v30, %s2791_s5  ;;  %s2038_s5 = sshll.u32 %s1790_s16, 7 }
 0x488   : > { %1529 = vrot.lane.b32.xlu0 %v2414_v31, %s2792_s26  ;;  %s1794_s26 = sshll.u32 %s3143_s1, 4  ;;  %s3314_s26 = int_to_ptr.vmem [resolvable:$true] %s1794_s26 }
 0x48c   : > { %1657 = vrot.lane.b32.xlu0 %v2415_v32, %s2793_s19 }
 0x4b6   : > { %v880_v33 = vpop.xlane.xlu0 %879 }
 0x4b7   : > { %2436 = vrcp.f32 %v880_v33 }
 0x4be   : > { %v1008_v35 = vpop.xlane.xlu1 %1007 }
 0x4bf   : > { %2438 = vrcp.f32 %v1008_v35 }
 0x4c2   : > { %v1146_v43 = vpop.permute.xlu1 %1145 }
 0x4c4   : > { %v2437_v36 = vpop.eup %2436 }
 0x4c5   : > { %v882_v37 = vmul.f32 %v2437_v36, %v3233_v59 }
 0x4c6   : > { %v1136_v38 = vpop.xlane.xlu0 %1135 }
 0x4c7   : > { %2440 = vrcp.f32 %v1136_v38  ;;  %v883_v39 = vpack.c.bf16 %v882_v37, %v882_v37 }
 0x4c9   : > { %2136 = vmatmul.mubr.msk.bf16.vlgmr.msra.gmra.mxu0 %vm749_vm6, %v883_v39 }
 0x4ca   : > { %2146 = vmatpush3.bf16.msra.mxu0 %v1018_v34  ;;  %2147 = vmatprep.mubr.msk.bf16.mxu0 %vm2786_vm3, %v2785_v26  ;;  %v1274_v47 = vpop.permute.xlu0 %1273 }
 0x4cb   : > { %2157 = vmatprep.subr.bf16.mxu0 %v2785_v26 }
 0x4cc   : > { %v2439_v40 = vpop.eup %2438 }
 0x4cd   : > { %v1010_v41 = vmul.f32 %v2439_v40, %v3237_v62 }
 0x4cf   : > { %v1011_v42 = vpack.c.bf16 %v1010_v41, %v1010_v41 }
 0x4d1   : > { %2148 = vmatmul.mubr.msk.bf16.vlgmr.msra.gmra.mxu0 %vm749_vm6, %v1011_v42 }
 0x4d2   : > { %2158 = vmatpush3.bf16.msra.mxu0 %v1146_v43  ;;  %2159 = vmatprep.mubr.msk.bf16.mxu0 %vm2786_vm3, %v2785_v26 }
 0x4d3   : > { %2169 = vmatprep.subr.bf16.mxu0 %v2785_v26 }
 0x4d4   : > { %v2441_v44 = vpop.eup %2440 }
 0x4d5   : > { %v1138_v45 = vmul.f32 %v2441_v44, %v3241_v0 }
 0x4d7   : > { %v1139_v46 = vpack.c.bf16 %v1138_v45, %v1138_v45 }
 0x4d9   : > { %2160 = vmatmul.mubr.msk.bf16.vlgmr.msra.gmra.mxu0 %vm749_vm6, %v1139_v46  ;;  %v2032_v46 = vld [vmem:[%s3453_s7] ss:$0 sm:$0xff] }
 0x4da   : > { %2170 = vmatpush3.bf16.msra.mxu0 %v1274_v47  ;;  %2171 = vmatprep.mubr.msk.bf16.mxu0 %vm2786_vm3, %v2785_v26 }
 0x4db   : > { %2181 = vmatprep.subr.bf16.mxu0 %v2785_v26 }
 0x4f3   : > { %v1264_v48 = vpop.xlane.xlu1 %1263 }
 0x4f4   : > { %2442 = vrcp.f32 %v1264_v48 }
 0x4f7   : > { %v1392_v49 = vpop.xlane.xlu1 %1391 }
 0x4f8   : > { %2444 = vrcp.f32 %v1392_v49 }
 0x4fb   : > { %v1520_v50 = vpop.xlane.xlu0 %1519  ;;  %v1648_v51 = vpop.xlane.xlu1 %1647 }
 0x4fc   : > { %2446 = vrcp.f32 %v1520_v50 }
 0x4fd   : > { %2448 = vrcp.f32 %v1648_v51 }
 0x4ff   : > { %v1402_v54 = vpop.permute.xlu1 %1401  ;;  %v1530_v58 = vpop.permute.xlu0 %1529 }
 0x501   : > { %v2443_v52 = vpop.eup %2442 }
 0x502   : > { %v1266_v53 = vmul.f32 %v2443_v52, %v2429_v21 }
 0x503   : > { %v1658_v62 = vpop.permute.xlu0 %1657 }
 0x504   : > { %v1267_v55 = vpack.c.bf16 %v1266_v53, %v1266_v53 }
 0x505   : > { %v2445_v56 = vpop.eup %2444 }
 0x506   : > { %2172 = vmatmul.mubr.msk.bf16.vlgmr.msra.gmra.mxu0 %vm749_vm6, %v1267_v55  ;;  %v1394_v57 = vmul.f32 %v2445_v56, %v3255_v23 }
 0x507   : > { %2182 = vmatpush3.bf16.msra.mxu0 %v1402_v54  ;;  %2183 = vmatprep.mubr.msk.bf16.mxu0 %vm2786_vm3, %v2785_v26 }
 0x508   : > { %2193 = vmatprep.subr.bf16.mxu0 %v2785_v26  ;;  %v1395_v59 = vpack.c.bf16 %v1394_v57, %v1394_v57 }
 0x509   : > { %v2447_v60 = vpop.eup %2446 }
 0x50a   : > { %v1522_v61 = vmul.f32 %v2447_v60, %v3257_v24  ;;  %v2449_v0 = vpop.eup %2448 }
 0x50b   : > { %v1650_v1 = vmul.f32 %v2449_v0, %v3261_v27  ;;  %v2416_v27 = vld [vmem:[#allocation16 + $0x8] sm:$0xff]  }
 0x50c   : > { %v1523_v63 = vpack.c.bf16 %v1522_v61, %v1522_v61  ;;  %2212 = vmatpush3.bf16.msra.mxu1 %v2416_v27 }
 0x50d   : > { %v1651_v4 = vpack.c.bf16 %v1650_v1, %v1650_v1  ;;  %2213 = vmatprep.subr.bf16.mxu1 %v2785_v26 }
 0x50e   : > { %2184 = vmatmul.mubr.msk.bf16.vlgmr.msra.gmra.mxu0 %vm749_vm6, %v1395_v59 }
 0x50f   : > { %2194 = vmatpush3.bf16.msra.mxu0 %v1530_v58  ;;  %2195 = vmatprep.mubr.msk.bf16.mxu0 %vm2786_vm3, %v2785_v26 }
 0x510   : > { %2205 = vmatprep.subr.bf16.mxu0 %v2785_v26  ;;  %2214 = vmatpush3.bf16.msra.mxu1 %v2417_v29 }
 0x516   : > { %2196 = vmatmul.mubr.msk.bf16.vlgmr.msra.gmra.mxu0 %vm749_vm6, %v1523_v63 }
 0x517   : > { %2206 = vmatpush3.bf16.msra.mxu0 %v1658_v62  ;;  %2207 = vmatprep.mubr.msk.bf16.mxu0 %vm2786_vm3, %v2785_v26 }
 0x518   : > { %v805_v2 = vpop.f32.mrf.mxu0 }
 0x519   : > { %811 = vst.msk [vmem:[#allocation4] sm:$0xff] %vm702_vm4, %v805_v2 }
 0x51a   : > { %v2125_v3 = vpop.f32.mrf.mxu0 }
 0x51c   : > { %v808_v5 = vpop.f32.mrf.mxu0 }
 0x51e   : > { %2208 = vmatmul.mubr.msk.bf16.vlgmr.msra.gmra.mxu0 %vm749_vm6, %v1651_v4  ;;  %v2126_v6 = vpop.f32.mrf.mxu0 }
 0x589   : > { %v929_v7 = vpop.f32.mrf.mxu0 }
 0x58a   : > { %936 = vrot.lane.b32.xlu1 %v929_v7, %s2794_s2 }
 0x58b   : > { %v2137_v8 = vpop.f32.mrf.mxu0 }
 0x58d   : > { %v932_v9 = vpop.f32.mrf.mxu0 }
 0x58f   : > { %v2138_v10 = vpop.f32.mrf.mxu0 }
 0x591   : > { %v1057_v11 = vpop.f32.mrf.mxu0 }
 0x592   : > { %1064 = vrot.lane.b32.xlu0 %v1057_v11, %s2795_s20  ;;  %s3454_s20 = sld [smem:[#allocation37_spill]] }
 0x593   : > { %v2149_v12 = vpop.f32.mrf.mxu0 }
 0x595   : > { %v1060_v13 = vpop.f32.mrf.mxu0 }
 0x597   : > { %v2150_v14 = vpop.f32.mrf.mxu0 }
 0x599   : > { %v1185_v15 = vpop.f32.mrf.mxu0 }
 0x59a   : > { %1192 = vrot.lane.b32.xlu1 %v1185_v15, %s2796_s18  ;;  %s3312_s18 = scalar_lea.hbm %s3454_s20, %s2038_s5 }
 0x59b   : > { %v2161_v16 = vpop.f32.mrf.mxu0 }
 0x59d   : > { %v1188_v17 = vpop.f32.mrf.mxu0 }
 0x59f   : > { %v2162_v18 = vpop.f32.mrf.mxu0 }
 0x5c6   : > { %v1313_v19 = vpop.f32.mrf.mxu0 }
 0x5c7   : > { %1320 = vrot.lane.b32.xlu0 %v1313_v19, %s2797_s3  ;;  %s1779_s3 = scalar_lea.sflag [#allocation7], %s3115_s23 }
 0x5c8   : > { %v2173_v20 = vpop.f32.mrf.mxu0 }
 0x5ca   : > { %v1316_v21 = vpop.f32.mrf.mxu0 }
 0x5cc   : > { %v2174_v22 = vpop.f32.mrf.mxu0 }
 0x5ce   : > { %v1441_v23 = vpop.f32.mrf.mxu0 }
 0x5cf   : > { %1448 = vrot.lane.b32.xlu1 %v1441_v23, %s2798_s4  ;;  %s2638_s4 = scalar_lea.vmem %s3314_s26, 128 }
 0x5d0   : > { %v2185_v24 = vpop.f32.mrf.mxu0  ;;  %p2639_p5 = scmp.ne.s32.totalorder %s3314_s26, %s2638_s4 }
 0x5d2   : > { %v1444_v25 = vpop.f32.mrf.mxu0  ;;  %p2640_p12 = pnand %p2639_p5, %p3455_p4 }
 0x5d4   : > { %v2186_v28 = vpop.f32.mrf.mxu0  ;;  %p2641_p0 = pneg %p2640_p12 }
 0x5d6   : > { %v1569_v30 = vpop.f32.mrf.mxu0 }
 0x5d7   : > { %1576 = vrot.lane.b32.xlu0 %v1569_v30, %s2799_s6  ;;  %s2801_s6 = smov [#allocation17]  }
 0x5d8   : > { %v2197_v31 = vpop.f32.mrf.mxu0 }
 0x5da   : > { %v1572_v32 = vpop.f32.mrf.mxu0 }
 0x5dc   : > { %v2198_v33 = vpop.f32.mrf.mxu0 }
 0x5de   : > { %v1697_v34 = vpop.f32.mrf.mxu0 }
 0x5df   : > { %1704 = vrot.lane.b32.xlu1 %v1697_v34, %s2800_s22  ;;  %s2642_s22 = sshll.u32 %s2801_s6, 4  ;;  %s2643_s22 = int_to_ptr.vmem [resolvable:$false] %s2642_s22 }
 0x5e0   : > { %v2209_v35 = vpop.f32.mrf.mxu0  ;;  %s2644_s28 = scalar_lea.vmem %s2643_s22, 256  ;;  %p2645_p8 = scmp.lt.s32.totalorder %s3314_s26, %s2643_s22 }
 0x5e1   : > { %p2646_p1 = scmp.lt.s32.totalorder %s2644_s28, %s2638_s4 }
 0x5e2   : > { %v1700_v36 = vpop.f32.mrf.mxu0 }
 0x5e3   : > { %p2647_p9 = por %p2646_p1, %p2645_p8 }
 0x5e4   : > { %v2210_v37 = vpop.f32.mrf.mxu0 }
 0x5e5   : > { %p2648_p11 = pnand %p2647_p9, %p2641_p0 }
 0x5fc   : > { %v937_v38 = vpop.permute.xlu1 %936 }
 0x5fd   : > { %940 = vst.msk [vmem:[#allocation4] sm:$0xff] %vm939_vm7, %v937_v38 }
 0x604   : > { %v1065_v39 = vpop.permute.xlu0 %1064 }
 0x605   : > { %1068 = vst.msk [vmem:[#allocation4] sm:$0xff] %vm1067_vm8, %v1065_v39 }
 0x60c   : > { %v1193_v26 = vpop.permute.xlu1 %1192 }
 0x60d   : > { %1196 = vst.msk [vmem:[#allocation4] sm:$0xff] %vm1195_vm9, %v1193_v26 }
 0x639   : > { %v1321_v40 = vpop.permute.xlu0 %1320 }
 0x63a   : > { %1324 = vst.msk [vmem:[#allocation4] sm:$0xff] %vm1323_vm10, %v1321_v40 }
 0x641   : > { %v1449_v41 = vpop.permute.xlu1 %1448 }
 0x642   : > { %1452 = vst.msk [vmem:[#allocation4] sm:$0xff] %vm1451_vm11, %v1449_v41 }
 0x649   : > { %v1577_v42 = vpop.permute.xlu0 %1576 }
 0x64a   : > { %1580 = vst.msk [vmem:[#allocation4] sm:$0xff] %vm1579_vm12, %v1577_v42 }
 0x651   : > { %v1705_v43 = vpop.permute.xlu1 %1704 }
 0x652   : > { %1708 = vst.msk [vmem:[#allocation4] sm:$0xff] %vm1707_vm13, %v1705_v43 }
 0x659   : > { %v1709_v44 = vld [vmem:[#allocation4] sm:$0xff] }
 0x65a   : > { %v1710_v45 = vpack.c.bf16 %v1709_v44, %v1709_v44 }
 0x65c   : > { %2216 = vmatmul.mubr.msk.bf16.vlgmr.msra.gmra.mxu1 %vm647_vm5, %v1710_v45 }
 0x71c   : > { %v1771_v47 = vpop.f32.mrf.mxu1 }
 0x71d   : > { %v1772_v48 = vadd.f32 %v2032_v46, %v1771_v47 }
 0x71e   : > { %v2217_v49 = vpop.f32.mrf.mxu1 }
 0x71f   : > { %1777 = vst.msk [vmem:[%s3143_s1] sm:$0xff] %vm647_vm5, %v1772_v48 }
 0x720   : > { %v1774_v50 = vpop.f32.mrf.mxu1 }
 0x721   : > { %2651 = shalt.err (!%p2648_p11)
}
 0x722   : > { %s2652_s1 = scalar_lea.hbm %s3312_s18, 128  ;;  %s2656_s25 = scalar_lea.hbm %s3454_s20, 512 }
 0x723   : > { %p2653_p3 = scmp.ne.s32.totalorder %s3312_s18, %s2652_s1  ;;  %p2657_p2 = scmp.lt.s32.totalorder %s3312_s18, %s3454_s20 }
 0x724   : > { %p2658_p13 = scmp.lt.s32.totalorder %s2656_s25, %s2652_s1 }
 0x725   : > { %p2654_p7 = pnand %p2653_p3, %p3455_p4 }
 0x726   : > { %p2659_p6 = por %p2658_p13, %p2657_p2 }
 0x727   : > { %p2655_p10 = pneg %p2654_p7 }
 0x729   : > { %p2660_p5 = pnand %p2659_p6, %p2655_p10 }
 0x72b   : > { %2663 = shalt.err (!%p2660_p5)
}
 0x72c   : > { %2241 = dma.vmem_to_hbm [thread:$0]  (%p3455_p4), %s3314_s26, 128, %s3312_s18, %s1779_s3   ;;  %v2218_v51 = vpop.f32.mrf.mxu1 }
 0x72d PF: > { %p2279_p12 = scmp.ge.s32.totalorder %s2770_s15, 2  ;;  %s1806_s17 = sand.u32 1, %s2742_s30  }
 0x72e   : > { %p3456_p0 = scmp.ne.s32.totalorder %s3436_s21, 0  ;;  %s1807_s7 = scalar_lea.sflag [#allocation7], %s1806_s17 }
 0x730   : > { %p2267_p8 = pnand %p2279_p12, %p3456_p0 }
 0x732   : > { %p2268_p1 = pneg %p2267_p8 }
 0x734   : > { %2725 = dma.done.wait (%p2268_p1), %s1807_s7, 128  }
 0x735   : > { %2727 = vsyncadd (%p2268_p1), %s1807_s7, 4294967168  ;;  %s29_s15 = sadd.s32 1, %s2770_s15   ;;  %s3457_s27 = sld [smem:[#allocation23_spill]] }
 0x736   : > { %p26_p9 = scmp.ge.s32.totalorder %s29_s15, 6   ;;  %s3458_s5 = sld [smem:[#allocation28_spill]] }
 0x737   : > { %s3459_s26 = sld [smem:[#allocation29_spill]]  ;;  %s3460_s28 = smov %s2738_s29 }
 0x738   : > { %s3461_s29 = smov %s3063_s24  ;;  %s3462_s30 = smov %s2746_s9 }
 0x739   : > { %s3463_s9 = smov %s2750_s10  ;;  %s3464_s10 = smov %s3066_s8 }
 0x73a   : > { %s3465_s11 = smov %s2762_s13  ;;  %s3466_s12 = smov %s2766_s14 }
 0x73b   :  { %28 = sbr.rel (!%p26_p9) target bundleno = 22 (0x16), region = 141 }
 0x73c   : > { %s3467_s13 = smov %s3458_s5 }
 0x73d   : > { %s3468_s14 = smov %s3459_s26 }
 0x740   :  { %1812 = vsyncpa [#allocation6], 1 }
 0x741   :  { %1814 = vsyncpa [#allocation6 + $0x1], 1 }
 0x742   :  { %1815 = vsyncpa [#allocation9], 1 }
 0x743   :  { %1817 = vsyncpa [#allocation9 + $0x1], 1 }
 0x744   :  { %1818 = vsyncpa [#allocation12], 1 }
 0x745   :  { %1819 = vsyncpa [#allocation15], 1 }
 0x746   :  { %1820 = vsyncpa [#allocation7], 1 }
 0x747   :  { %1822 = vsyncpa [#allocation7 + $0x1], 1 }

</bundles_post_ra>
